<compile_context>
chip_gen: v7x
topology: tpu7x:2x2x1
jax: 0.10.0
libtpu: 0.0.40
codegen_flags: <defaults>
</compile_context>

<pallas_src>
import functools

import jax
import jax.numpy as jnp
from jax import lax
from jax.experimental import pallas as pl
from jax.experimental.pallas import tpu as pltpu


def _vq_kernel(x_ref, ehi_ref, elo_ref, esq_ref,
               enc_ref, q_ref, sse_ref, cnt_ref,
               *, n_rows, n_codes, tile_n, mask_rows):
    """One grid step: a (TN, D) tile of flattened tokens vs. the full codebook.

    x_ref   : (TN, D)     flat inputs tile (input dtype)
    ehi_ref : (Kp, D)     bf16 high half of the codebook (bf16(e)), resident
    elo_ref : (Kp, D)     bf16 residual half (bf16(e - f32(bf16(e)))), resident
    esq_ref : (1, Kp)     precomputed f32 ||e||^2 (padded entries = +huge)
    enc_ref : (TN, K)     one-hot encodings tile (output, logical width K)
    q_ref   : (TN, D)     quantized tile (output)
    sse_ref : (1, 1, D)   per-tile partial sum of squared error (output)
    cnt_ref : (1, 1, Kp)  per-tile column sums of encodings (output)
    """
    x = x_ref[...]                                      # (TN, D)
    e_hi = ehi_ref[...]                                 # (Kp, D) bf16
    e_lo = elo_ref[...]                                 # (Kp, D) bf16
    e_sq = esq_ref[...].astype(jnp.float32)             # (1, Kp)

    # score = ||e||^2 - 2 x.e  (||x||^2 is row-constant -> argmin-invariant).
    # Single bf16 MXU pass; dot_general contracts last dims -> no transpose.
    xb = x.astype(jnp.bfloat16)
    xe = lax.dot_general(xb, e_hi, (((1,), (1,)), ((), ())),
                         preferred_element_type=jnp.float32)        # (TN, Kp)
    score = e_sq - 2.0 * xe

    # argmin over the codebook axis (ties -> first index, like torch.argmin)
    idx = jnp.argmin(score, axis=1)                                  # (TN,)

    # one-hot encodings (== encodings.scatter_(1, idx, 1)); exact 0/1 in bf16
    k_iota = lax.broadcasted_iota(jnp.int32, score.shape, 1)         # (TN, Kp)
    hit = k_iota == idx[:, None]
    enc16 = hit.astype(jnp.bfloat16)

    # quantized = one-hot selection via two bf16 MXU passes.  Selection is
    # exact; e_hi + e_lo reproduces the f32 codebook row to ~1e-7 relative,
    # so this matches the PyTorch f32 `encodings @ embedding` for all
    # practical purposes at a fraction of the f32 multi-pass MXU cost.
    q = (jnp.dot(enc16, e_hi, preferred_element_type=jnp.float32)
         + jnp.dot(enc16, e_lo, preferred_element_type=jnp.float32))  # (TN, D)

    enc_out = enc16 if n_codes == enc16.shape[1] else enc16[:, :n_codes]
    enc_ref[...] = enc_out.astype(enc_ref.dtype)
    q_ref[...] = q.astype(q_ref.dtype)

    # Lane-dense per-tile partials; no carried accumulator so the grid axis is
    # fully "parallel".  Final scalar reductions happen in the JAX wrapper.
    diff = q - x.astype(jnp.float32)
    ones = hit.astype(jnp.float32)
    if mask_rows:
        # The last tile may extend past the logical row count: exclude bogus
        # rows from the loss / usage partials (their output rows are clipped
        # by the block write-back anyway).
        row = (pl.program_id(0) * tile_n
               + lax.broadcasted_iota(jnp.int32, (diff.shape[0], 1), 0))
        valid = row < n_rows                                         # (TN, 1)
        diff = jnp.where(valid, diff, 0.0)
        ones = jnp.where(valid, ones, 0.0)

    sse_ref[...] = jnp.sum(diff * diff, axis=0, keepdims=True)[None]
    cnt_ref[...] = jnp.sum(ones, axis=0, keepdims=True)[None]


def _vmem_capacity_bytes():
    """Generation-aware VMEM size (falls back to a v7x-safe 64 MiB)."""
    try:
        cap = getattr(pltpu.get_tpu_info(), "vmem_capacity_bytes", None)
        if cap:
            return int(cap)
    except Exception:
        pass
    return 64 * 1024 * 1024


def _pick_tile_n(n, requested, bytes_per_row, budget_bytes, row_align):
    """Largest row tile (multiple of row_align) fitting the VMEM budget, capped
    so the 1-D 'parallel' grid keeps >= 2 steps (v7x has 2 TensorCores)."""
    t = min(requested, n, max(budget_bytes // max(bytes_per_row, 1), row_align))
    if n >= 2 * row_align:
        t = min(t, n // 2)
    t -= t % row_align
    return max(t, row_align)


def vector_quantizer_forward(inputs, embedding, commitment_cost, *,
                             tile_n=1024, encodings_dtype=jnp.bfloat16,
                             straight_through=False):
    """JAX/Pallas forward of VectorQuantizer (forward-only).

    inputs    : (..., D) channel-last, D == embedding_dim
    embedding : (K, D) codebook weights
    Returns (loss, quantized, perplexity, encodings); forward values match the
    PyTorch module.  Notes:
      * Forward-only: gradients of `loss` through the kernel are not defined.
        With straight_through=True, quantized = inputs + stop_gradient(q - x),
        giving the PyTorch pass-through gradient w.r.t. inputs at the cost of
        one extra element-wise pass (off by default for inference).
      * encodings are exact 0/1 but default to bfloat16 to halve the largest
        HBM stream; pass encodings_dtype=jnp.float32 for the PyTorch dtype.
      * Distances use a bf16 MXU matmul; near-tie argmins can differ from an
        exact-f32 computation.
    """
    input_shape = inputs.shape
    K, D = embedding.shape
    if input_shape[-1] != D:
        raise ValueError("last input axis must equal embedding_dim")
    flat = inputs.reshape(-1, D)
    N = flat.shape[0]

    # --- codebook prep (tiny, done once on the XLA side) ----------------------
    # Pad K to a multiple of 128 so score / one-hot tiles are lane-dense;
    # padded codes get a huge ||e||^2 so they can never win the argmin.
    K_pad = max(128, ((K + 127) // 128) * 128)
    e32 = embedding.astype(jnp.float32)
    e_hi32 = e32.astype(jnp.bfloat16).astype(jnp.float32)
    e_hi = e_hi32.astype(jnp.bfloat16)                 # bf16(e)
    e_lo = (e32 - e_hi32).astype(jnp.bfloat16)         # bf16 residual
    e_sq = jnp.sum(e32 * e32, axis=1)                  # (K,) f32, hoisted ||e||^2
    if K_pad != K:
        pad = ((0, K_pad - K), (0, 0))
        e_hi = jnp.pad(e_hi, pad)
        e_lo = jnp.pad(e_lo, pad)
        e_sq_pad = jnp.full((1, K_pad), 1e30, jnp.float32).at[0, :K].set(e_sq)
    else:
        e_sq_pad = e_sq[None, :]

    # --- row alignment / tiny-N padding ---------------------------------------
    row_align = 32                                      # safe for f32/bf16/int8 tiles
    if N < row_align:                                   # rare; pad up to one tile row
        flat = jnp.pad(flat, ((0, row_align - N), (0, 0)))
    n_rows_padded = flat.shape[0]

    # --- generation-aware VMEM budget & tile size ------------------------------
    x_b = jnp.dtype(inputs.dtype).itemsize
    enc_b = jnp.dtype(encodings_dtype).itemsize
    vmem_limit = min(int(_vmem_capacity_bytes() * 0.75), 100 * 1024 * 1024)
    # TODO(synk): for very large codebooks (K*D*2*2 approaching the budget) add a
    # second "arbitrary" grid axis over K-tiles with an online running argmin.
    resident = 2 * (2 * K_pad * D * 2 + K_pad * 4)       # bf16 codebook halves + ||e||^2
    stream_row = 2 * (2 * D * x_b + K * enc_b)           # double-buffered x, q, enc tiles
    temp_row = 4 * (2 * K_pad + 3 * D)                   # in-kernel f32 score/xe/q/diff/x
    budget = vmem_limit - resident - 2 * 1024 * 1024     # slack for partial outputs
    tn = _pick_tile_n(n_rows_padded, tile_n, stream_row + temp_row, budget, row_align)
    grid_n = pl.cdiv(n_rows_padded, tn)
    mask_rows = grid_n * tn > N                          # ragged tail needs masking

    kern = functools.partial(_vq_kernel, n_rows=N, n_codes=K, tile_n=tn,
                             mask_rows=mask_rows)

    enc, quant_flat, sse_parts, cnt_parts = pl.pallas_call(
        kern,
        out_shape=(
            jax.ShapeDtypeStruct((n_rows_padded, K), encodings_dtype),
            jax.ShapeDtypeStruct((n_rows_padded, D), inputs.dtype),
            jax.ShapeDtypeStruct((grid_n, 1, D), jnp.float32),
            jax.ShapeDtypeStruct((grid_n, 1, K_pad), jnp.float32),
        ),
        grid_spec=pltpu.PrefetchScalarGridSpec(
            num_scalar_prefetch=0,
            grid=(grid_n,),
            in_specs=[
                pl.BlockSpec((tn, D), lambda i: (i, 0)),         # flat inputs tile
                pl.BlockSpec((K_pad, D), lambda i: (0, 0)),      # resident codebook (hi)
                pl.BlockSpec((K_pad, D), lambda i: (0, 0)),      # resident codebook (lo)
                pl.BlockSpec((1, K_pad), lambda i: (0, 0)),      # hoisted ||e||^2
            ],
            out_specs=[
                pl.BlockSpec((tn, K), lambda i: (i, 0)),         # encodings (width K)
                pl.BlockSpec((tn, D), lambda i: (i, 0)),         # quantized tile
                pl.BlockSpec((1, 1, D), lambda i: (i, 0, 0)),    # SSE partials
                pl.BlockSpec((1, 1, K_pad), lambda i: (i, 0, 0)),  # count partials
            ],
        ),
        compiler_params=pltpu.CompilerParams(
            dimension_semantics=("parallel",),   # no carried state -> shardable
            vmem_limit_bytes=vmem_limit,
        ),
    )(flat, e_hi, e_lo, e_sq_pad)

    # --- tiny epilogue reductions (no re-read of the big tensors) --------------
    sse = jnp.sum(sse_parts)
    mse = sse / jnp.float32(N * D)
    e_latent_loss = mse                 # F.mse_loss(quantized.detach(), inputs)
    q_latent_loss = mse                 # F.mse_loss(quantized, inputs.detach())
    loss = q_latent_loss + commitment_cost * e_latent_loss   # forward-only value

    quant_flat = quant_flat[:N] if n_rows_padded != N else quant_flat
    quantized = quant_flat.reshape(input_shape)
    if straight_through:
        # quantized = inputs + (quantized - inputs).detach(); identical forward
        # value, identity gradient w.r.t. inputs.
        quantized = inputs + lax.stop_gradient(quantized - inputs)

    counts = jnp.sum(cnt_parts, axis=(0, 1))[:K]             # (K,) exact integers
    avg_probs = counts / jnp.float32(N)
    perplexity = jnp.exp(-jnp.sum(avg_probs * jnp.log(avg_probs + 1e-10)))

    encodings = enc[:N] if n_rows_padded != N else enc
    return loss, quantized, perplexity, encodings


if __name__ == "__main__":
    # Small shapes consistent with the module (embedding axis last).
    batch, height, width = 2, 16, 16
    embedding_dim = 256       # module constant
    num_embeddings = 100      # module constant (padded to 128 inside the kernel)
    commitment_cost = 0.25

    key = jax.random.PRNGKey(0)
    k_emb, k_in, k_in2 = jax.random.split(key, 3)

    # nn.Embedding weight init: uniform(-1/K, 1/K), shape (K, D)
    embedding = jax.random.uniform(
        k_emb, (num_embeddings, embedding_dim),
        minval=-1.0 / num_embeddings, maxval=1.0 / num_embeddings,
        dtype=jnp.float32)
    inputs = jax.random.normal(
        k_in, (batch, height, width, embedding_dim), dtype=jnp.float32) * 0.05

    fwd = jax.jit(functools.partial(
        vector_quantizer_forward, commitment_cost=commitment_cost))
    loss, quantized, perplexity, encodings = fwd(inputs, embedding)
    jax.block_until_ready((loss, quantized, perplexity, encodings))

    # ---- reference mirroring the kernel's numerics (bf16 distance matmul) ----
    flat = inputs.reshape(-1, embedding_dim)
    e_sq = jnp.sum(embedding ** 2, axis=1)
    xe = jnp.dot(flat.astype(jnp.bfloat16), embedding.astype(jnp.bfloat16).T,
                 preferred_element_type=jnp.float32)
    idx = jnp.argmin(e_sq[None, :] - 2.0 * xe, axis=1)
    enc_ref = jax.nn.one_hot(idx, num_embeddings, dtype=jnp.float32)
    q_ref = jnp.take(embedding, idx, axis=0).reshape(inputs.shape)
    mse_ref = jnp.mean((q_ref - inputs) ** 2)
    loss_ref = (1.0 + commitment_cost) * mse_ref
    avg_ref = jnp.mean(enc_ref, axis=0)
    ppl_ref = jnp.exp(-jnp.sum(avg_ref * jnp.log(avg_ref + 1e-10)))

    assert quantized.shape == inputs.shape
    assert encodings.shape == (flat.shape[0], num_embeddings)
    assert jnp.allclose(quantized, q_ref, atol=1e-5)
    assert jnp.allclose(encodings.astype(jnp.float32), enc_ref)
    assert jnp.allclose(loss, loss_ref, atol=1e-6)
    assert jnp.allclose(perplexity, ppl_ref, atol=1e-3)

    # ---- sanity vs the exact-f32 PyTorch formula (near-ties may flip) ---------
    dist32 = (jnp.sum(flat ** 2, 1, keepdims=True) + e_sq
              - 2.0 * flat @ embedding.T)
    idx32 = jnp.argmin(dist32, axis=1)
    assert jnp.mean((idx32 == idx).astype(jnp.float32)) > 0.9
    loss32 = (1.0 + commitment_cost) * jnp.mean(
        (jnp.take(embedding, idx32, axis=0).reshape(inputs.shape) - inputs) ** 2)
    assert jnp.allclose(loss, loss32, atol=1e-6)

    # ---- ragged path: N (=35) not a multiple of the tile -> cdiv grid + mask --
    inputs2 = jax.random.normal(
        k_in2, (1, 5, 7, embedding_dim), dtype=jnp.float32) * 0.05
    l2, q2, p2, e2 = jax.jit(functools.partial(
        vector_quantizer_forward, commitment_cost=commitment_cost))(inputs2, embedding)
    jax.block_until_ready((l2, q2, p2, e2))
    flat2 = inputs2.reshape(-1, embedding_dim)
    xe2 = jnp.dot(flat2.astype(jnp.bfloat16), embedding.astype(jnp.bfloat16).T,
                  preferred_element_type=jnp.float32)
    idx2 = jnp.argmin(e_sq[None, :] - 2.0 * xe2, axis=1)
    q2_ref = jnp.take(embedding, idx2, axis=0).reshape(inputs2.shape)
    assert q2.shape == inputs2.shape and e2.shape == (35, num_embeddings)
    assert jnp.allclose(q2, q2_ref, atol=1e-5)
    assert jnp.allclose(
        l2, (1.0 + commitment_cost) * jnp.mean((q2_ref - inputs2) ** 2), atol=1e-6)

    print("KERNEL_OK")
</pallas_src>

<mosaic_0001>
module attributes {stable_mosaic.version = 11 : i64} {
  func.func @_vq_kernel(%arg0: i32, %arg1: memref<256x256xf32, #tpu.memory_space<vmem>>, %arg2: memref<128x256xbf16, #tpu.memory_space<vmem>>, %arg3: memref<128x256xbf16, #tpu.memory_space<vmem>>, %arg4: memref<1x128xf32, #tpu.memory_space<vmem>>, %arg5: memref<256x100xbf16, #tpu.memory_space<vmem>>, %arg6: memref<256x256xf32, #tpu.memory_space<vmem>>, %arg7: memref<1x1x256xf32, #tpu.memory_space<vmem>>, %arg8: memref<1x1x128xf32, #tpu.memory_space<vmem>>) attributes {dimension_semantics = [#tpu.dimension_semantics<parallel>], iteration_bounds = array<i64: 2>, scalar_prefetch = 0 : i64, scratch_operands = 0 : i64, tpu.core_type = #tpu.core_type<tc>, window_params = [{transform_indices = @transform_0, window_bounds = array<i64: 256, 256>}, {pipeline_mode = #tpu.pipeline_mode<synchronous>, transform_indices = @transform_1, window_bounds = array<i64: 128, 256>}, {pipeline_mode = #tpu.pipeline_mode<synchronous>, transform_indices = @transform_2, window_bounds = array<i64: 128, 256>}, {pipeline_mode = #tpu.pipeline_mode<synchronous>, transform_indices = @transform_3, window_bounds = array<i64: 1, 128>}, {transform_indices = @transform_4, window_bounds = array<i64: 256, 100>}, {transform_indices = @transform_5, window_bounds = array<i64: 256, 256>}, {transform_indices = @transform_6, window_bounds = array<i64: 1, 1, 256>}, {transform_indices = @transform_7, window_bounds = array<i64: 1, 1, 128>}]} {
    %c0 = arith.constant 0 : index
    %c0_0 = arith.constant 0 : index
    %0 = vector.load %arg1[%c0, %c0_0] : memref<256x256xf32, #tpu.memory_space<vmem>>, vector<256x256xf32>
    %c0_1 = arith.constant 0 : index
    %c0_2 = arith.constant 0 : index
    %1 = vector.load %arg2[%c0_1, %c0_2] : memref<128x256xbf16, #tpu.memory_space<vmem>>, vector<128x256xbf16>
    %c0_3 = arith.constant 0 : index
    %c0_4 = arith.constant 0 : index
    %2 = vector.load %arg3[%c0_3, %c0_4] : memref<128x256xbf16, #tpu.memory_space<vmem>>, vector<128x256xbf16>
    %c0_5 = arith.constant 0 : index
    %c0_6 = arith.constant 0 : index
    %3 = vector.load %arg4[%c0_5, %c0_6] : memref<1x128xf32, #tpu.memory_space<vmem>>, vector<1x128xf32>
    %4 = arith.truncf %0 : vector<256x256xf32> to vector<256x256xbf16>
    %cst = arith.constant dense<0.000000e+00> : vector<256x128xf32>
    %5 = tpu.matmul %4, %1, %cst {dimension_numbers = #tpu.dot_dimension_numbers<[1], [1], [0], [0], [0, 0, 1, 0], [], []>} : vector<256x256xbf16>, vector<128x256xbf16>, vector<256x128xf32> -> vector<256x128xf32>
    %cst_7 = arith.constant 2.000000e+00 : f32
    %6 = vector.broadcast %cst_7 : f32 to vector<256x128xf32>
    %7 = arith.mulf %6, %5 : vector<256x128xf32>
    %8 = vector.broadcast %3 : vector<1x128xf32> to vector<256x128xf32>
    %9 = arith.subf %8, %7 : vector<256x128xf32>
    %10 = tpu.reduce_index %9 {axis = 1 : i32, kind = #tpu.reduction_kind<arg_min>} : vector<256x128xf32> -> vector<256xi32>
    %11 = tpu.iota {dimensions = array<i32: 1>} : vector<256x128xi32>
    %12 = vector.shape_cast %10 : vector<256xi32> to vector<256x1xi32>
    %13 = vector.broadcast %12 : vector<256x1xi32> to vector<256x128xi32>
    %14 = arith.cmpi eq, %11, %13 : vector<256x128xi32>
    %15 = arith.extui %14 : vector<256x128xi1> to vector<256x128xi32>
    %16 = arith.sitofp %15 : vector<256x128xi32> to vector<256x128xf32>
    %17 = arith.truncf %16 : vector<256x128xf32> to vector<256x128xbf16>
    %cst_8 = arith.constant dense<0.000000e+00> : vector<256x256xf32>
    %18 = tpu.matmul %17, %1, %cst_8 {dimension_numbers = #tpu.dot_dimension_numbers<[1], [0], [0], [1], [0, 0, 1, 1], [], []>} : vector<256x128xbf16>, vector<128x256xbf16>, vector<256x256xf32> -> vector<256x256xf32>
    %cst_9 = arith.constant dense<0.000000e+00> : vector<256x256xf32>
    %19 = tpu.matmul %17, %2, %cst_9 {dimension_numbers = #tpu.dot_dimension_numbers<[1], [0], [0], [1], [0, 0, 1, 1], [], []>} : vector<256x128xbf16>, vector<128x256xbf16>, vector<256x256xf32> -> vector<256x256xf32>
    %20 = arith.addf %18, %19 : vector<256x256xf32>
    %21 = vector.extract_strided_slice %17 {offsets = [0, 0], sizes = [256, 100], strides = [1, 1]} : vector<256x128xbf16> to vector<256x100xbf16>
    %c0_10 = arith.constant 0 : index
    %c0_11 = arith.constant 0 : index
    %22 = vector.load %arg5[%c0_10, %c0_11] : memref<256x100xbf16, #tpu.memory_space<vmem>>, vector<256x100xbf16>
    tpu.vector_store %arg5[%c0_10, %c0_11], %21 {strides = array<i32>} : memref<256x100xbf16, #tpu.memory_space<vmem>>, vector<256x100xbf16>,
    %c0_12 = arith.constant 0 : index
    %c0_13 = arith.constant 0 : index
    %23 = vector.load %arg6[%c0_12, %c0_13] : memref<256x256xf32, #tpu.memory_space<vmem>>, vector<256x256xf32>
    tpu.vector_store %arg6[%c0_12, %c0_13], %20 {strides = array<i32>} : memref<256x256xf32, #tpu.memory_space<vmem>>, vector<256x256xf32>,
    %24 = arith.subf %20, %0 : vector<256x256xf32>
    %25 = arith.extui %14 : vector<256x128xi1> to vector<256x128xi32>
    %26 = arith.sitofp %25 : vector<256x128xi32> to vector<256x128xf32>
    %27 = arith.mulf %24, %24 : vector<256x256xf32>
    %cst_14 = arith.constant dense<0.000000e+00> : vector<256xf32>
    %28 = vector.multi_reduction <add>, %27, %cst_14 [0] : vector<256x256xf32> to vector<256xf32>
    %29 = vector.shape_cast %28 : vector<256xf32> to vector<1x256xf32>
    %30 = vector.shape_cast %29 : vector<1x256xf32> to vector<1x1x256xf32>
    %c0_15 = arith.constant 0 : index
    %c0_16 = arith.constant 0 : index
    %c0_17 = arith.constant 0 : index
    %31 = vector.load %arg7[%c0_15, %c0_16, %c0_17] : memref<1x1x256xf32, #tpu.memory_space<vmem>>, vector<1x1x256xf32>
    tpu.vector_store %arg7[%c0_15, %c0_16, %c0_17], %30 {strides = array<i32>} : memref<1x1x256xf32, #tpu.memory_space<vmem>>, vector<1x1x256xf32>,
    %cst_18 = arith.constant dense<0.000000e+00> : vector<128xf32>
    %32 = vector.multi_reduction <add>, %26, %cst_18 [0] : vector<256x128xf32> to vector<128xf32>
    %33 = vector.shape_cast %32 : vector<128xf32> to vector<1x128xf32>
    %34 = vector.shape_cast %33 : vector<1x128xf32> to vector<1x1x128xf32>
    %c0_19 = arith.constant 0 : index
    %c0_20 = arith.constant 0 : index
    %c0_21 = arith.constant 0 : index
    %35 = vector.load %arg8[%c0_19, %c0_20, %c0_21] : memref<1x1x128xf32, #tpu.memory_space<vmem>>, vector<1x1x128xf32>
    tpu.vector_store %arg8[%c0_19, %c0_20, %c0_21], %34 {strides = array<i32>} : memref<1x1x128xf32, #tpu.memory_space<vmem>>, vector<1x1x128xf32>,
    return
  }
  func.func @transform_0(%arg0: i32) -> (i32, i32) {
    %c0_i32 = arith.constant 0 : i32
    %c0_i32_0 = arith.constant 0 : i32
    return %arg0, %c0_i32 : i32, i32
  }
  func.func @transform_1(%arg0: i32) -> (i32, i32) {
    %c0_i32 = arith.constant 0 : i32
    %c0_i32_0 = arith.constant 0 : i32
    %c0_i32_1 = arith.constant 0 : i32
    return %c0_i32, %c0_i32_0 : i32, i32
  }
  func.func @transform_2(%arg0: i32) -> (i32, i32) {
    %c0_i32 = arith.constant 0 : i32
    %c0_i32_0 = arith.constant 0 : i32
    %c0_i32_1 = arith.constant 0 : i32
    return %c0_i32, %c0_i32_0 : i32, i32
  }
  func.func @transform_3(%arg0: i32) -> (i32, i32) {
    %c0_i32 = arith.constant 0 : i32
    %c0_i32_0 = arith.constant 0 : i32
    %c0_i32_1 = arith.constant 0 : i32
    return %c0_i32, %c0_i32_0 : i32, i32
  }
  func.func @transform_4(%arg0: i32) -> (i32, i32) {
    %c0_i32 = arith.constant 0 : i32
    %c0_i32_0 = arith.constant 0 : i32
    return %arg0, %c0_i32 : i32, i32
  }
  func.func @transform_5(%arg0: i32) -> (i32, i32) {
    %c0_i32 = arith.constant 0 : i32
    %c0_i32_0 = arith.constant 0 : i32
    return %arg0, %c0_i32 : i32, i32
  }
  func.func @transform_6(%arg0: i32) -> (i32, i32, i32) {
    %c0_i32 = arith.constant 0 : i32
    %c0_i32_0 = arith.constant 0 : i32
    %c0_i32_1 = arith.constant 0 : i32
    return %arg0, %c0_i32, %c0_i32_0 : i32, i32, i32
  }
  func.func @transform_7(%arg0: i32) -> (i32, i32, i32) {
    %c0_i32 = arith.constant 0 : i32
    %c0_i32_0 = arith.constant 0 : i32
    %c0_i32_1 = arith.constant 0 : i32
    return %arg0, %c0_i32, %c0_i32_0 : i32, i32, i32
  }
}

</mosaic_0001>

<bundles_post_ra>
// kernel: vector_quantizer_forward.1
= control target key start
LH: loop header
LB: loop body
LE: loop exit
PB: predicated region body
PF: predicated region fallthrough
CT: control target
= control target key end

     0   :  { %13 = vsyncpa [#allocation3], 0  ;;  %s3728_s0 = inlined_call_operand.hbm [shape: f32[512,256], index: 0, kind: input, shape index: {}]   ;;  %s3729_s1 = inlined_call_operand.vmem [shape: bf16[128,256], index: 1, kind: input, shape index: {}]   ;;  %s3730_s2 = inlined_call_operand.vmem [shape: bf16[128,256], index: 2, kind: input, shape index: {}]   ;;  %s3731_s3 = inlined_call_operand.vmem [shape: f32[1,128], index: 3, kind: input, shape index: {}]   ;;  %s3732_s4 = inlined_call_operand.vmem [shape: bf16[512,100], index: 4, kind: output, shape index: {0}]   ;;  %s3733_s5 = inlined_call_operand.hbm [shape: f32[512,256], index: 5, kind: output, shape index: {1}]   ;;  %s3734_s6 = inlined_call_operand.vmem [shape: f32[2,1,256], index: 6, kind: output, shape index: {2}]   ;;  %s3735_s7 = inlined_call_operand.vmem [shape: f32[2,1,128], index: 7, kind: output, shape index: {3}]  }
   0x1   :  { %15 = vsyncpa [#allocation3 + $0x1], 0 }
   0x2   :  { %16 = vsyncpa [#allocation4], 0 }
   0x3   :  { %18 = vsyncpa [#allocation4 + $0x1], 0  ;;  %s2677_s24 = smov 0   ;;  %s2679_s25 = smov 0  }
   0x4   :  { %s2681_s26 = smov 0   ;;  %s2683_s27 = smov 0  }
   0x5 LB: > { %s2698_s28 = sadd.s32 4294967295, %s2625_s27   ;;  %s2067_s29 = sadd.s32 4294967294, %s2625_s27   ;;  %s2625_s27 = sphi %s2683_s27, %s3784_s27   ;;  %s2621_s26 = sphi %s2681_s26, %s3783_s26   ;;  %s2617_s25 = sphi %s2679_s25, %s3782_s25   ;;  %s2613_s24 = sphi %s2677_s24, %s3781_s24  }
   0x6   : > { %s2702_s30 = sadd.s32 1, %s2625_s27   ;;  %s31_s8 = sadd.s32 1, %s2621_s26 }
   0x7   : > { %s28_s9 = ssub.s32 %s2625_s27, %s2702_s30  ;;  %p38_p0 = scmp.ne.s32.totalorder %s2621_s26, %s2617_s25 }
   0x8   : > { %p29_p1 = scmp.eq.s32.totalorder %s28_s9, 0  ;;  %p39_p2 = scmp.eq.s32.totalorder %s2625_s27, 0 }
   0x9   : > { %p44_p3 = scmp.ne.s32.totalorder %s2617_s25, %s2613_s24  ;;  %p45_p4 = scmp.eq.s32.totalorder %s2698_s28, 0 }
   0xa   : > { %s2714_s10 = scalar_select %p29_p1, %s2621_s26, %s31_s8  }
   0xb   : > { %p2716_p5 = por %p39_p2, %p38_p0  ;;  %p2720_p6 = por %p45_p4, %p44_p3 }
   0xc   : > { %p157_p7 = scmp.eq.s32.totalorder %s2698_s28, 1  ;;  %p163_p8 = scmp.eq.s32.totalorder %s2067_s29, 1 }
   0xd   : > { %p2375_p10 = scmp.lt.s32.totalorder %s2625_s27, 2  ;;  %s244_s15 = sand.u32 1, %s2621_s26  }
   0xe   : > { %p2727_p11 = por %p157_p7, %p38_p0  ;;  %p2731_p12 = por %p163_p8, %p44_p3 }
   0xf   : > { %s2248_s16 = sshll.u32 %s2625_s27, 13  ;;  %s2070_s17 = sshll.u32 %s244_s15, 9 }
  0x10   : > { %s3744_s13 = scalar_select %p2727_p11, 1, 0 }
  0x11   : > { %s3745_s14 = scalar_select %p2731_p12, 1, 0 }
  0x12   : > { %s2740_s20 = scalar_lea.hbm %s3728_s0, %s2248_s16  ;;  %s248_s21 = scalar_lea.vmem [#allocation2], %s2070_s17 }
  0x13   : > { %s256_s22 = sshll.u32 %s248_s21, 4  ;;  %p2744_p13 = pnand %p2375_p10, %p2716_p5  ;;  %s2748_s22 = int_to_ptr.vmem [resolvable:$true] %s256_s22 }
  0x14   : > { %s2750_s29 = scalar_lea.sflag [#allocation3], %s244_s15  ;;  %s2529_s8 = scalar_lea.hbm %s2740_s20, 8192 }
  0x15   : > { %p2530_p0 = scmp.ne.s32.totalorder %s2740_s20, %s2529_s8  ;;  %p2531_p1 = pneg %p2744_p13 }
  0x16   : > { %s2534_s16 = scalar_lea.hbm %s3728_s0, 16384  ;;  %p2535_p4 = scmp.lt.u32.totalorder %s2740_s20, %s3728_s0 }
  0x17   : > { %p2532_p2 = pnand %p2531_p1, %p2530_p0  ;;  %p2536_p5 = scmp.lt.u32.totalorder %s2534_s16, %s2529_s8 }
  0x18   : > { %p2538_p8 = scmp.lt.u32.totalorder %s2529_s8, %s2740_s20 }
  0x19   : > { %p2533_p3 = pneg %p2532_p2  ;;  %p2537_p7 = por %p2536_p5, %p2535_p4 }
  0x1b   : > { %p2539_p10 = por %p2538_p8, %p2537_p7 }
  0x1d   : > { %p2540_p9 = pnand %p2539_p10, %p2533_p3 }
  0x1f   : > { %2543 = shalt.err (!%p2540_p9)
}
  0x20   : > { %s2544_s15 = scalar_lea.vmem %s2748_s22, 8192  ;;  %s2627_s19 = smov [#allocation2]  }
  0x21   : > { %p2545_p0 = scmp.ne.s32.totalorder %s2748_s22, %s2544_s15  ;;  %s2549_s21 = sshll.u32 %s2627_s19, 4  ;;  %s2550_s21 = int_to_ptr.vmem [resolvable:$false] %s2549_s21 }
  0x22   : > { %s2551_s9 = scalar_lea.vmem %s2550_s21, 16384  ;;  %p2552_p11 = scmp.lt.s32.totalorder %s2748_s22, %s2550_s21 }
  0x23   : > { %p2547_p2 = pnand %p2545_p0, %p2531_p1  ;;  %p2553_p4 = scmp.lt.s32.totalorder %s2551_s9, %s2544_s15 }
  0x25   : > { %p2548_p12 = pneg %p2547_p2  ;;  %p2554_p5 = por %p2553_p4, %p2552_p11 }
  0x27   : > { %p2555_p7 = pnand %p2554_p5, %p2548_p12 }
  0x29   : > { %2558 = shalt.err (!%p2555_p7)
}
  0x2a   : > { %s2628_s8 = smov 256   ;;  %s2629_s11 = smov 16  }
  0x2b   : > { %2370 = dma.hbm_to_vmem [thread:$0]  (!%p2744_p13), %s2740_s20, 8192, %s2748_s22, %s2750_s29, %s2628_s8, %s2628_s8, %s2629_s11  }
  0x2c   : > { %p2074_p9 = scmp.ge.s32.totalorder %s2625_s27, 1  ;;  %p264_p1 = scmp.lt.s32.totalorder %s2625_s27, 3 }
  0x2e   : > { %p265_p3 = pnand %p2074_p9, %p264_p1 }
  0x2f   : > { %s2781_s16 = sand.u32 (!%p265_p3), 1, %s2617_s25  }
  0x30   : > { %268 = sbr.rel (%p265_p3) target bundleno = 985 (0x3d9), region = 36  ;;  %s2075_s17 = sshll.u32 (!%p265_p3), %s2781_s16, 9 }
  0x31   : > { %s271_s18 = scalar_lea.sflag (!%p265_p3), [#allocation3], %s2781_s16  ;;  %s2787_s15 = scalar_lea.vmem (!%p265_p3), [#allocation2], %s2075_s17 }
  0x37   : > { %2604 = dma.done.wait (%p2720_p6), %s271_s18, 8192  }
  0x38   : > { %2606 = vsyncadd (%p2720_p6), %s271_s18, 4294959104  ;;  %v2796_v0 = vld [vmem:[%s3729_s1 + $0x4] ss:$8 sps:$4 sm:$0xff]   ;;  %v2801_v1 = vld [vmem:[%s3729_s1] ss:$8 sps:$4 sm:$0xff]   ;;  %s2077_s20 = sshll.u32 %s2698_s28, 5 }
  0x39   : > { %542 = vmatprep.subr.bf16.mxu0 %v2796_v0  ;;  %v2807_v2 = vld [vmem:[%s3729_s1 + $0x14] ss:$8 sps:$4 sm:$0xff]   ;;  %v2814_v3 = vld [vmem:[%s3729_s1 + $0x10] ss:$8 sps:$4 sm:$0xff]   ;;  %v2819_v4 = vld [vmem:[%s3729_s1 + $0x24] ss:$8 sps:$4 sm:$0xff]  }
  0x3a   : > { %543 = vmatpush1.bf16.xpose.msra.mxu0 %v2801_v1  ;;  %v334_v5 = vld [vmem:[%s2787_s15 + $0x8] sm:$0xff]  ;;  %v336_v6 = vld [vmem:[%s2787_s15 + $0x18] sm:$0xff]  ;;  %v333_v19 = vld [vmem:[%s2787_s15] sm:$0xff]  ;;  %p319_p6 = scmp.lt.s32.totalorder %s2077_s20, 63  ;;  %vm1529_vm1 = vcmask 814080   ;;  %p325_p11 = scmp.lt.s32.totalorder %s2698_s28, 1 }
  0x3b   : > { %544 = vmatprep.subr.bf16.mxu0 %v2807_v2  ;;  %v431_v7 = vpack.c.bf16 %v336_v6, %v334_v5  ;;  %v2828_v8 = vld [vmem:[%s3729_s1 + $0x20] ss:$8 sps:$4 sm:$0xff]   ;;  %v2833_v9 = vld [vmem:[%s3729_s1 + $0x34] ss:$8 sps:$4 sm:$0xff]   ;;  %v2840_v10 = vld [vmem:[%s3729_s1 + $0x30] ss:$8 sps:$4 sm:$0xff]  }
  0x3c   : > { %v2845_v11 = vld [vmem:[%s3729_s1 + $0x44] ss:$8 sps:$4 sm:$0xff]   ;;  %v2852_v12 = vld [vmem:[%s3729_s1 + $0x40] ss:$8 sps:$4 sm:$0xff]   ;;  %v2857_v13 = vld [vmem:[%s3729_s1 + $0x54] ss:$8 sps:$4 sm:$0xff]  }
  0x3d   : > { %574 = vmatprep.mubr.bf16.mxu0 %v431_v7  ;;  %v2864_v14 = vld [vmem:[%s3729_s1 + $0x50] ss:$8 sps:$4 sm:$0xff]   ;;  %v2869_v15 = vld [vmem:[%s3729_s1 + $0x64] ss:$8 sps:$4 sm:$0xff]   ;;  %v2876_v16 = vld [vmem:[%s3729_s1 + $0x60] ss:$8 sps:$4 sm:$0xff]  }
  0x3e   : > { %v2881_v17 = vld [vmem:[%s3729_s1 + $0x74] ss:$8 sps:$4 sm:$0xff]   ;;  %v2888_v18 = vld [vmem:[%s3729_s1 + $0x70] ss:$8 sps:$4 sm:$0xff]   ;;  %v338_v21 = vld [vmem:[%s2787_s15 + $0x28] sm:$0xff]  ;;  %s3786_s20 = smov (!%p319_p6, %s2077_s20), 63 }
  0x3f   : > { %v335_v20 = vld [vmem:[%s2787_s15 + $0x10] sm:$0xff]  ;;  %v340_v22 = vld [vmem:[%s2787_s15 + $0x38] sm:$0xff]  ;;  %v337_v25 = vld [vmem:[%s2787_s15 + $0x20] sm:$0xff]  ;;  %s2078_s22 = sshll.u32 %s3786_s20, 2  ;;  %s3541_s11 = scalar_lea.vmem [#allocation5], %s2075_s17 }
  0x40   : > { %v430_v23 = vpack.c.bf16 %v335_v20, %v333_v19  ;;  %v433_v24 = vpack.c.bf16 %v340_v22, %v338_v21  ;;  %v339_v26 = vld [vmem:[%s2787_s15 + $0x30] sm:$0xff]  ;;  %v342_v27 = vld [vmem:[%s2787_s15 + $0x48] sm:$0xff]  ;;  %v344_v28 = vld [vmem:[%s2787_s15 + $0x58] sm:$0xff]  ;;  %s3085_s19 = scalar_lea.vmem %s3732_s4, %s2078_s22  ;;  %s2282_s17 = sshll.u32 %s2698_s28, 13 }
  0x41   : > { %v432_v29 = vpack.c.bf16 %v339_v26, %v337_v25  ;;  %v435_v30 = vpack.c.bf16 %v344_v28, %v342_v27  ;;  %v341_v31 = vld [vmem:[%s2787_s15 + $0x40] sm:$0xff]  ;;  %v343_v32 = vld [vmem:[%s2787_s15 + $0x50] sm:$0xff]  ;;  %v346_v33 = vld [vmem:[%s2787_s15 + $0x68] sm:$0xff]  ;;  %s3502_s21 = scalar_select %p325_p11, %s2698_s28, 1 }
  0x42   : > { %545 = vmatpush1.bf16.xpose.msra.mxu0 %v2814_v3  ;;  %v348_v34 = vld [vmem:[%s2787_s15 + $0x78] sm:$0xff]  ;;  %v434_v35 = vpack.c.bf16 %v343_v32, %v341_v31  ;;  %v345_v37 = vld [vmem:[%s2787_s15 + $0x60] sm:$0xff]  ;;  %v347_v38 = vld [vmem:[%s2787_s15 + $0x70] sm:$0xff]  ;;  %s1920_s18 = sshll.u32 %s3541_s11, 4  ;;  %s3670_s23 = scalar_lea.hbm %s3733_s5, %s2282_s17  ;;  %s3672_s18 = int_to_ptr.vmem [resolvable:$true] %s1920_s18 }
  0x43   : > { %546 = vmatprep.subr.bf16.mxu0 %v2819_v4  ;;  %v437_v36 = vpack.c.bf16 %v348_v34, %v346_v33  ;;  %v350_v39 = vld [vmem:[%s2787_s15 + $0x88] sm:$0xff]  ;;  %v352_v40 = vld [vmem:[%s2787_s15 + $0x98] sm:$0xff]  ;;  %v436_v41 = vpack.c.bf16 %v347_v38, %v345_v37  ;;  %v349_v43 = vld [vmem:[%s2787_s15 + $0x80] sm:$0xff]  ;;  %s331_s8 = scalar_lea.vmem %s3735_s7, %s3502_s21  ;;  %s1895_s28 = scalar_lea.sflag [#allocation4], %s2781_s16 }
  0x44   : > { %v439_v42 = vpack.c.bf16 %v352_v40, %v350_v39  ;;  %v351_v44 = vld [vmem:[%s2787_s15 + $0x90] sm:$0xff]  ;;  %v354_v45 = vld [vmem:[%s2787_s15 + $0xa8] sm:$0xff]  ;;  %v356_v46 = vld [vmem:[%s2787_s15 + $0xb8] sm:$0xff]  ;;  %s2559_s29 = scalar_lea.vmem %s3672_s18, 8192  ;;  %p3778_p13 = scmp.ne.s32.totalorder %s3744_s13, 0 }
  0x45   : > { %v438_v47 = vpack.c.bf16 %v351_v44, %v349_v43  ;;  %v441_v48 = vpack.c.bf16 %v356_v46, %v354_v45  ;;  %v353_v49 = vld [vmem:[%s2787_s15 + $0xa0] sm:$0xff]  ;;  %v355_v50 = vld [vmem:[%s2787_s15 + $0xb0] sm:$0xff]  ;;  %v358_v51 = vld [vmem:[%s2787_s15 + $0xc8] sm:$0xff]  ;;  %p2560_p12 = scmp.ne.s32.totalorder %s3672_s18, %s2559_s29 }
  0x46   : > { %v360_v52 = vld [vmem:[%s2787_s15 + $0xd8] sm:$0xff]  ;;  %v440_v53 = vpack.c.bf16 %v355_v50, %v353_v49  ;;  %v357_v55 = vld [vmem:[%s2787_s15 + $0xc0] sm:$0xff]  ;;  %v359_v56 = vld [vmem:[%s2787_s15 + $0xd0] sm:$0xff] }
  0x47   : > { %v443_v54 = vpack.c.bf16 %v360_v52, %v358_v51  ;;  %v362_v57 = vld [vmem:[%s2787_s15 + $0xe8] sm:$0xff]  ;;  %v364_v58 = vld [vmem:[%s2787_s15 + $0xf8] sm:$0xff]  ;;  %v442_v59 = vpack.c.bf16 %v359_v56, %v357_v55  ;;  %v361_v61 = vld [vmem:[%s2787_s15 + $0xe0] sm:$0xff]  ;;  %p2561_p8 = pnand %p2560_p12, %p3778_p13 }
  0x48   : > { %v445_v60 = vpack.c.bf16 %v364_v58, %v362_v57  ;;  %v363_v62 = vld [vmem:[%s2787_s15 + $0xf0] sm:$0xff]  ;;  %v366_v63 = vld [vmem:[%s2787_s15 + $0x108] sm:$0xff]  ;;  %v368_v5 = vld [vmem:[%s2787_s15 + $0x118] sm:$0xff] }
  0x49   : > { %v444_v6 = vpack.c.bf16 %v363_v62, %v361_v61  ;;  %v447_v7 = vpack.c.bf16 %v368_v5, %v366_v63  ;;  %v365_v19 = vld [vmem:[%s2787_s15 + $0x100] sm:$0xff]  ;;  %v367_v20 = vld [vmem:[%s2787_s15 + $0x110] sm:$0xff]  ;;  %v370_v21 = vld [vmem:[%s2787_s15 + $0x128] sm:$0xff]  ;;  %p2562_p10 = pneg %p2561_p8 }
  0x4a   : > { %547 = vmatpush1.bf16.xpose.msra.mxu0 %v2828_v8  ;;  %v372_v22 = vld [vmem:[%s2787_s15 + $0x138] sm:$0xff]  ;;  %v369_v25 = vld [vmem:[%s2787_s15 + $0x120] sm:$0xff]  ;;  %v371_v26 = vld [vmem:[%s2787_s15 + $0x130] sm:$0xff] }
  0x4b   : > { %548 = vmatprep.subr.bf16.mxu0 %v2833_v9  ;;  %v374_v27 = vld [vmem:[%s2787_s15 + $0x148] sm:$0xff]  ;;  %v376_v28 = vld [vmem:[%s2787_s15 + $0x158] sm:$0xff]  ;;  %v373_v31 = vld [vmem:[%s2787_s15 + $0x140] sm:$0xff] }
  0x4c   : > { %v375_v32 = vld [vmem:[%s2787_s15 + $0x150] sm:$0xff]  ;;  %v378_v33 = vld [vmem:[%s2787_s15 + $0x168] sm:$0xff]  ;;  %v380_v34 = vld [vmem:[%s2787_s15 + $0x178] sm:$0xff] }
  0x4d   : > { %v377_v37 = vld [vmem:[%s2787_s15 + $0x160] sm:$0xff]  ;;  %v379_v38 = vld [vmem:[%s2787_s15 + $0x170] sm:$0xff]  ;;  %v382_v39 = vld [vmem:[%s2787_s15 + $0x188] sm:$0xff] }
  0x4e   : > { %v384_v40 = vld [vmem:[%s2787_s15 + $0x198] sm:$0xff]  ;;  %v381_v43 = vld [vmem:[%s2787_s15 + $0x180] sm:$0xff]  ;;  %v383_v44 = vld [vmem:[%s2787_s15 + $0x190] sm:$0xff] }
  0x4f   : > { %v386_v45 = vld [vmem:[%s2787_s15 + $0x1a8] sm:$0xff]  ;;  %v388_v46 = vld [vmem:[%s2787_s15 + $0x1b8] sm:$0xff]  ;;  %v385_v49 = vld [vmem:[%s2787_s15 + $0x1a0] sm:$0xff] }
  0x50   : > { %v387_v50 = vld [vmem:[%s2787_s15 + $0x1b0] sm:$0xff]  ;;  %v390_v51 = vld [vmem:[%s2787_s15 + $0x1c8] sm:$0xff]  ;;  %v392_v52 = vld [vmem:[%s2787_s15 + $0x1d8] sm:$0xff] }
  0x51   : > { %v389_v55 = vld [vmem:[%s2787_s15 + $0x1c0] sm:$0xff]  ;;  %v391_v56 = vld [vmem:[%s2787_s15 + $0x1d0] sm:$0xff]  ;;  %v394_v57 = vld [vmem:[%s2787_s15 + $0x1e8] sm:$0xff] }
  0x52   : > { %549 = vmatpush1.bf16.xpose.msra.mxu0 %v2840_v10  ;;  %v396_v58 = vld [vmem:[%s2787_s15 + $0x1f8] sm:$0xff]  ;;  %v393_v61 = vld [vmem:[%s2787_s15 + $0x1e0] sm:$0xff]  ;;  %v395_v62 = vld [vmem:[%s2787_s15 + $0x1f0] sm:$0xff] }
  0x53   : > { %550 = vmatprep.subr.bf16.mxu0 %v2845_v11  ;;  %v460_v63 = vpack.c.bf16 %v395_v62, %v393_v61 }
  0x5a   : > { %551 = vmatpush1.bf16.xpose.msra.mxu0 %v2852_v12 }
  0x5b   : > { %552 = vmatprep.subr.bf16.mxu0 %v2857_v13 }
  0x62   : > { %553 = vmatpush1.bf16.xpose.msra.mxu0 %v2864_v14 }
  0x63   : > { %554 = vmatprep.subr.bf16.mxu0 %v2869_v15 }
  0x6a   : > { %555 = vmatpush1.bf16.xpose.msra.mxu0 %v2876_v16 }
  0x6b   : > { %556 = vmatprep.subr.bf16.mxu0 %v2881_v17 }
  0x72   : > { %557 = vmatpush1.bf16.xpose.msra.mxu0 %v2888_v18 }
  0x79   : > { %575 = vmatmul.mubr.bf16.vlgmr.msra.gmra.mrb[0].mxu0 %v430_v23  ;;  %v446_v23 = vpack.c.bf16 %v367_v20, %v365_v19 }
  0x7a   : > { %582 = vmatprep.mubr.bf16.mxu0 %v433_v24  ;;  %v449_v24 = vpack.c.bf16 %v372_v22, %v370_v21 }
  0x81   : > { %583 = vmatmul.mubr.bf16.gmra.mrb[4].mxu0 %v432_v29  ;;  %v448_v29 = vpack.c.bf16 %v371_v26, %v369_v25 }
  0x82   : > { %590 = vmatprep.mubr.bf16.mxu0 %v435_v30  ;;  %v451_v30 = vpack.c.bf16 %v376_v28, %v374_v27  ;;  %v2441_v28 = vld [vmem:[%s3730_s2 + $0x4] ss:$8 sps:$4 sm:$0xff]  }
  0x83   : > { %2283 = vmatprep.subr.bf16.mxu1 %v2441_v28  ;;  %1031 = vmatprep.subr.bf16.mxu0 %v2441_v28 }
  0x89   : > { %591 = vmatmul.mubr.bf16.gmra.mrb[8].mxu0 %v434_v35  ;;  %v450_v35 = vpack.c.bf16 %v375_v32, %v373_v31 }
  0x8a   : > { %598 = vmatprep.mubr.bf16.mxu0 %v437_v36  ;;  %v453_v36 = vpack.c.bf16 %v380_v34, %v378_v33  ;;  %v2446_v34 = vld [vmem:[%s3730_s2 + $0x10] ss:$8 sps:$4 sm:$0xff]  }
  0x91   : > { %599 = vmatmul.mubr.bf16.gmra.mrb[12].mxu0 %v436_v41  ;;  %v452_v41 = vpack.c.bf16 %v379_v38, %v377_v37  ;;  %v2449_v37 = vld [vmem:[%s3730_s2 + $0x20] ss:$8 sps:$4 sm:$0xff]   ;;  %v2450_v38 = vld [vmem:[%s3730_s2 + $0x34] ss:$8 sps:$4 sm:$0xff]  }
  0x92   : > { %606 = vmatprep.mubr.bf16.mxu0 %v439_v42  ;;  %v455_v42 = vpack.c.bf16 %v384_v40, %v382_v39 }
  0x99   : > { %607 = vmatmul.mubr.bf16.gmra.mrb[16].mxu0 %v438_v47  ;;  %v454_v47 = vpack.c.bf16 %v383_v44, %v381_v43  ;;  %v2453_v44 = vld [vmem:[%s3730_s2 + $0x44] ss:$8 sps:$4 sm:$0xff]  }
  0x9a   : > { %614 = vmatprep.mubr.bf16.mxu0 %v441_v48  ;;  %v457_v48 = vpack.c.bf16 %v388_v46, %v386_v45  ;;  %v2455_v45 = vld [vmem:[%s3730_s2 + $0x40] ss:$8 sps:$4 sm:$0xff]   ;;  %v2456_v46 = vld [vmem:[%s3730_s2 + $0x54] ss:$8 sps:$4 sm:$0xff]  }
  0xa1   : > { %615 = vmatmul.mubr.bf16.gmra.mrb[20].mxu0 %v440_v53  ;;  %v456_v53 = vpack.c.bf16 %v387_v50, %v385_v49  ;;  %v2458_v50 = vld [vmem:[%s3730_s2 + $0x50] ss:$8 sps:$4 sm:$0xff]  }
  0xa2   : > { %622 = vmatprep.mubr.bf16.mxu0 %v443_v54  ;;  %v459_v54 = vpack.c.bf16 %v392_v52, %v390_v51  ;;  %v2459_v52 = vld [vmem:[%s3730_s2 + $0x64] ss:$8 sps:$4 sm:$0xff]  }
  0xa9   : > { %623 = vmatmul.mubr.bf16.gmra.mrb[24].mxu0 %v442_v59  ;;  %v458_v59 = vpack.c.bf16 %v391_v56, %v389_v55 }
  0xaa   : > { %630 = vmatprep.mubr.bf16.mxu0 %v445_v60  ;;  %v461_v60 = vpack.c.bf16 %v396_v58, %v394_v57  ;;  %v3022_v58 = vld [vmem:[%s3731_s3] ss:$0 sm:$0xff] }
  0xb1   : > { %631 = vmatmul.mubr.bf16.gmra.mrb[28].mxu0 %v444_v6 }
  0xb2   : > { %638 = vmatprep.mubr.bf16.mxu0 %v447_v7 }
  0xb9   : > { %639 = vmatmul.mubr.bf16.gmra.mrb[32].mxu0 %v446_v23 }
  0xba   : > { %646 = vmatprep.mubr.bf16.mxu0 %v449_v24 }
  0xc1   : > { %647 = vmatmul.mubr.bf16.gmra.mrb[36].mxu0 %v448_v29  ;;  %v2443_v29 = vld [vmem:[%s3730_s2] ss:$8 sps:$4 sm:$0xff]  }
  0xc2   : > { %654 = vmatprep.mubr.bf16.mxu0 %v451_v30  ;;  %v2444_v30 = vld [vmem:[%s3730_s2 + $0x14] ss:$8 sps:$4 sm:$0xff]   ;;  %2291 = vmatpush1.bf16.msra.mxu1 %v2443_v29 }
  0xc3   : > { %1032 = vmatpush1.bf16.msra.mxu0 %v2443_v29  ;;  %2284 = vmatprep.subr.bf16.mxu1 %v2444_v30 }
  0xc4   : > { %1033 = vmatprep.subr.bf16.mxu0 %v2444_v30 }
  0xc6   : > { %2292 = vmatpush1.bf16.msra.mxu1 %v2446_v34 }
  0xc7   : > { %1034 = vmatpush1.bf16.msra.mxu0 %v2446_v34 }
  0xc9   : > { %655 = vmatmul.mubr.bf16.gmra.mrb[40].mxu0 %v450_v35 }
  0xca   : > { %662 = vmatprep.mubr.bf16.mxu0 %v453_v36  ;;  %v2447_v36 = vld [vmem:[%s3730_s2 + $0x24] ss:$8 sps:$4 sm:$0xff]  }
  0xcb   : > { %2285 = vmatprep.subr.bf16.mxu1 %v2447_v36  ;;  %1035 = vmatprep.subr.bf16.mxu0 %v2447_v36 }
  0xcc   : > { %2293 = vmatpush1.bf16.msra.mxu1 %v2449_v37  ;;  %1036 = vmatpush1.bf16.msra.mxu0 %v2449_v37 }
  0xcd   : > { %2286 = vmatprep.subr.bf16.mxu1 %v2450_v38  ;;  %1037 = vmatprep.subr.bf16.mxu0 %v2450_v38  ;;  %v2462_v38 = vld [vmem:[%s3730_s2 + $0x74] ss:$8 sps:$4 sm:$0xff]  }
  0xd1   : > { %663 = vmatmul.mubr.bf16.gmra.mrb[44].mxu0 %v452_v41 }
  0xd2   : > { %670 = vmatprep.mubr.bf16.mxu0 %v455_v42  ;;  %v2452_v42 = vld [vmem:[%s3730_s2 + $0x30] ss:$8 sps:$4 sm:$0xff]  }
  0xd3   : > { %2294 = vmatpush1.bf16.msra.mxu1 %v2452_v42  ;;  %1038 = vmatpush1.bf16.msra.mxu0 %v2452_v42 }
  0xd4   : > { %2287 = vmatprep.subr.bf16.mxu1 %v2453_v44  ;;  %1039 = vmatprep.subr.bf16.mxu0 %v2453_v44  ;;  %v2630_v44 = vmov 0  }
  0xd5   : > { %1123 = vmatprep.mubr.bf16.mxu1 %v2630_v44 }
  0xd7   : > { %2295 = vmatpush1.bf16.msra.mxu1 %v2455_v45  ;;  %1040 = vmatpush1.bf16.msra.mxu0 %v2455_v45 }
  0xd8   : > { %2288 = vmatprep.subr.bf16.mxu1 %v2456_v46  ;;  %1041 = vmatprep.subr.bf16.mxu0 %v2456_v46 }
  0xd9   : > { %671 = vmatmul.mubr.bf16.gmra.mrb[48].mxu0 %v454_v47 }
  0xda   : > { %678 = vmatprep.mubr.bf16.mxu0 %v457_v48 }
  0xdb   : > { %2296 = vmatpush1.bf16.msra.mxu1 %v2458_v50  ;;  %1042 = vmatpush1.bf16.msra.mxu0 %v2458_v50 }
  0xdc   : > { %2289 = vmatprep.subr.bf16.mxu1 %v2459_v52  ;;  %1043 = vmatprep.subr.bf16.mxu0 %v2459_v52 }
  0xe1   : > { %679 = vmatmul.mubr.bf16.gmra.mrb[52].mxu0 %v456_v53  ;;  %v2461_v53 = vld [vmem:[%s3730_s2 + $0x60] ss:$8 sps:$4 sm:$0xff]  }
  0xe2   : > { %686 = vmatprep.mubr.bf16.mxu0 %v459_v54  ;;  %2297 = vmatpush1.bf16.msra.mxu1 %v2461_v53 }
  0xe3   : > { %1044 = vmatpush1.bf16.msra.mxu0 %v2461_v53  ;;  %2290 = vmatprep.subr.bf16.mxu1 %v2462_v38 }
  0xe4   : > { %1045 = vmatprep.subr.bf16.mxu0 %v2462_v38 }
  0xe9   : > { %687 = vmatmul.mubr.bf16.gmra.mrb[56].mxu0 %v458_v59 }
  0xea   : > { %694 = vmatprep.mubr.bf16.mxu0 %v461_v60 }
  0xf1   : > { %695 = vmatmul.mubr.bf16.gmra.mrb[60].mxu0 %v460_v63 }
  0xf2   : > { %1063 = vmatprep.mubr.bf16.mxu0 %v2630_v44 }
 0x14c   : > { %v2953_v5 = vpop.f32.mrb[0].mxu0 }
 0x14d   : > { %v578_v6 = vpop.f32.mrb[1].mxu0 }
 0x14e   : > { %v2955_v7 = vpop.f32.mrb[2].mxu0 }
 0x14f   : > { %v581_v19 = vpop.f32.mrb[3].mxu0 }
 0x154   : > { %v2957_v20 = vpop.f32.mrb[4].mxu0 }
 0x155   : > { %v586_v21 = vpop.f32.mrb[5].mxu0 }
 0x156   : > { %v2959_v22 = vpop.f32.mrb[6].mxu0 }
 0x157   : > { %v589_v23 = vpop.f32.mrb[7].mxu0 }
 0x15c   : > { %v2961_v24 = vpop.f32.mrb[8].mxu0 }
 0x15d   : > { %v594_v25 = vpop.f32.mrb[9].mxu0 }
 0x15e   : > { %v2963_v26 = vpop.f32.mrb[10].mxu0 }
 0x15f   : > { %v597_v27 = vpop.f32.mrb[11].mxu0 }
 0x164   : > { %v2974_v31 = vpop.f32.mrb[12].mxu0 }
 0x165   : > { %v602_v32 = vpop.f32.mrb[13].mxu0 }
 0x166   : > { %v2976_v33 = vpop.f32.mrb[14].mxu0 }
 0x167   : > { %v605_v35 = vpop.f32.mrb[15].mxu0 }
 0x16c   : > { %v2990_v39 = vpop.f32.mrb[16].mxu0 }
 0x16d   : > { %v610_v40 = vpop.f32.mrb[17].mxu0 }
 0x16e   : > { %v2992_v41 = vpop.f32.mrb[18].mxu0  ;;  %v2464_v40 = vld [vmem:[%s3730_s2 + $0x70] ss:$8 sps:$4 sm:$0xff]  }
 0x16f   : > { %v613_v43 = vpop.f32.mrb[19].mxu0  ;;  %2298 = vmatpush1.bf16.msra.mxu1 %v2464_v40  ;;  %1046 = vmatpush1.bf16.msra.mxu0 %v2464_v40 }
 0x170   : > { %1224 = vmatprep.subr.bf16.mxu1 %v2796_v0 }
 0x174   : > { %v3006_v47 = vpop.f32.mrb[20].mxu0 }
 0x175   : > { %v618_v48 = vpop.f32.mrb[21].mxu0 }
 0x176   : > { %v3008_v49 = vpop.f32.mrb[22].mxu0 }
 0x177   : > { %v621_v51 = vpop.f32.mrb[23].mxu0 }
 0x17c   : > { %v624_v54 = vpop.f32.mrb[24].mxu0 }
 0x17d   : > { %v715_v55 = vmul.f32 2.0, %v624_v54  ;;  %v626_v56 = vpop.f32.mrb[25].mxu0 }
 0x17e   : > { %v627_v57 = vpop.f32.mrb[26].mxu0 }
 0x17f   : > { %v716_v59 = vmul.f32 2.0, %v627_v57  ;;  %v629_v60 = vpop.f32.mrb[27].mxu0  ;;  %v753_v61 = vsub.f32 %v3022_v58, %v715_v55 }
 0x181   : > { %797 = vmin.index.xlane.f32.xlu0 %v753_v61  ;;  %v754_v62 = vsub.f32 %v3022_v58, %v716_v59 }
 0x184   : > { %v632_v63 = vpop.f32.mrb[28].mxu0 }
 0x185   : > { %v717_v6 = vmul.f32 2.0, %v632_v63  ;;  %799 = vmin.index.xlane.f32.xlu0 %v754_v62  ;;  %v634_v19 = vpop.f32.mrb[29].mxu0 }
 0x186   : > { %v635_v21 = vpop.f32.mrb[30].mxu0 }
 0x187   : > { %v718_v23 = vmul.f32 2.0, %v635_v21  ;;  %v637_v25 = vpop.f32.mrb[31].mxu0  ;;  %v755_v27 = vsub.f32 %v3022_v58, %v717_v6 }
 0x189   : > { %801 = vmin.index.xlane.f32.xlu1 %v755_v27  ;;  %v756_v28 = vsub.f32 %v3022_v58, %v718_v23 }
 0x18c   : > { %v640_v29 = vpop.f32.mrb[32].mxu0 }
 0x18d   : > { %v719_v30 = vmul.f32 2.0, %v640_v29  ;;  %803 = vmin.index.xlane.f32.xlu1 %v756_v28  ;;  %v642_v32 = vpop.f32.mrb[33].mxu0 }
 0x18e   : > { %v643_v34 = vpop.f32.mrb[34].mxu0 }
 0x18f   : > { %v720_v35 = vmul.f32 2.0, %v643_v34  ;;  %v645_v36 = vpop.f32.mrb[35].mxu0  ;;  %v757_v37 = vsub.f32 %v3022_v58, %v719_v30 }
 0x191   : > { %805 = vmin.index.xlane.f32.xlu0 %v757_v37  ;;  %v758_v42 = vsub.f32 %v3022_v58, %v720_v35 }
 0x193   : > { %807 = vmin.index.xlane.f32.xlu1 %v758_v42 }
 0x194   : > { %v648_v43 = vpop.f32.mrb[36].mxu0 }
 0x195   : > { %v721_v45 = vmul.f32 2.0, %v648_v43  ;;  %v650_v46 = vpop.f32.mrb[37].mxu0 }
 0x196   : > { %v651_v48 = vpop.f32.mrb[38].mxu0 }
 0x197   : > { %v722_v50 = vmul.f32 2.0, %v651_v48  ;;  %v653_v51 = vpop.f32.mrb[39].mxu0  ;;  %v759_v52 = vsub.f32 %v3022_v58, %v721_v45 }
 0x199   : > { %809 = vmin.index.xlane.f32.xlu0 %v759_v52  ;;  %v760_v53 = vsub.f32 %v3022_v58, %v722_v50 }
 0x19b   : > { %811 = vmin.index.xlane.f32.xlu1 %v760_v53 }
 0x19c   : > { %v656_v54 = vpop.f32.mrb[40].mxu0 }
 0x19d   : > { %v723_v0 = vmul.f32 2.0, %v656_v54  ;;  %v658_v55 = vpop.f32.mrb[41].mxu0 }
 0x19e   : > { %v659_v56 = vpop.f32.mrb[42].mxu0 }
 0x19f   : > { %v724_v57 = vmul.f32 2.0, %v659_v56  ;;  %v661_v59 = vpop.f32.mrb[43].mxu0  ;;  %v761_v60 = vsub.f32 %v3022_v58, %v723_v0 }
 0x1a1   : > { %813 = vmin.index.xlane.f32.xlu0 %v761_v60  ;;  %v762_v61 = vsub.f32 %v3022_v58, %v724_v57 }
 0x1a3   : > { %815 = vmin.index.xlane.f32.xlu1 %v762_v61 }
 0x1a4   : > { %v664_v62 = vpop.f32.mrb[44].mxu0 }
 0x1a5   : > { %v725_v63 = vmul.f32 2.0, %v664_v62  ;;  %v666_v6 = vpop.f32.mrb[45].mxu0 }
 0x1a6   : > { %v667_v19 = vpop.f32.mrb[46].mxu0 }
 0x1a7   : > { %v726_v21 = vmul.f32 2.0, %v667_v19  ;;  %v669_v23 = vpop.f32.mrb[47].mxu0  ;;  %v763_v25 = vsub.f32 %v3022_v58, %v725_v63  ;;  %v703_v63 = vmul.f32 2.0, %v2953_v5  ;;  %v707_v5 = vmul.f32 2.0, %v2961_v24 }
 0x1a8   : > { %v704_v23 = vmul.f32 2.0, %v2955_v7  ;;  %v708_v7 = vmul.f32 2.0, %v2963_v26  ;;  %v711_v24 = vmul.f32 2.0, %v2990_v39  ;;  %v712_v26 = vmul.f32 2.0, %v2992_v41 }
 0x1a9   : > { %817 = vmin.index.xlane.f32.xlu0 %v763_v25  ;;  %v764_v27 = vsub.f32 %v3022_v58, %v726_v21  ;;  %v837_v41 = vlaneseq }
 0x1ab   : > { %819 = vmin.index.xlane.f32.xlu1 %v764_v27  ;;  %v705_v27 = vmul.f32 2.0, %v2957_v20  ;;  %v709_v20 = vmul.f32 2.0, %v2974_v31  ;;  %v713_v31 = vmul.f32 2.0, %v3006_v47  ;;  %v3079_v47 = vand.u32 127, %v837_v41 }
 0x1ac   : > { %v672_v28 = vpop.f32.mrb[48].mxu0 }
 0x1ad   : > { %v727_v29 = vmul.f32 2.0, %v672_v28  ;;  %v674_v30 = vpop.f32.mrb[49].mxu0  ;;  %v741_v28 = vsub.f32 %v3022_v58, %v703_v63  ;;  %v751_v39 = vsub.f32 %v3022_v58, %v713_v31 }
 0x1ae   : > { %v675_v32 = vpop.f32.mrb[50].mxu0  ;;  %v742_v30 = vsub.f32 %v3022_v58, %v704_v23 }
 0x1af   : > { %v728_v34 = vmul.f32 2.0, %v675_v32  ;;  %v677_v35 = vpop.f32.mrb[51].mxu0  ;;  %v765_v36 = vsub.f32 %v3022_v58, %v727_v29  ;;  %v706_v29 = vmul.f32 2.0, %v2959_v22  ;;  %v743_v32 = vsub.f32 %v3022_v58, %v705_v27 }
 0x1b0   : > { %v745_v35 = vsub.f32 %v3022_v58, %v707_v5  ;;  %v710_v22 = vmul.f32 2.0, %v2976_v33  ;;  %v714_v33 = vmul.f32 2.0, %v3008_v49  ;;  %v2631_v49 = vmov 0.0  }
 0x1b1   : > { %821 = vmin.index.xlane.f32.xlu0 %v765_v36  ;;  %v766_v37 = vsub.f32 %v3022_v58, %v728_v34  ;;  %v744_v34 = vsub.f32 %v3022_v58, %v706_v29  ;;  %v746_v36 = vsub.f32 %v3022_v58, %v708_v7 }
 0x1b3   : > { %823 = vmin.index.xlane.f32.xlu1 %v766_v37  ;;  %v747_v37 = vsub.f32 %v3022_v58, %v709_v20 }
 0x1b4   : > { %v680_v38 = vpop.f32.mrb[52].mxu0 }
 0x1b5   : > { %v729_v40 = vmul.f32 2.0, %v680_v38  ;;  %v682_v42 = vpop.f32.mrb[53].mxu0  ;;  %v748_v38 = vsub.f32 %v3022_v58, %v710_v22 }
 0x1b6   : > { %v683_v43 = vpop.f32.mrb[54].mxu0  ;;  %v750_v42 = vsub.f32 %v3022_v58, %v712_v26 }
 0x1b7   : > { %v730_v45 = vmul.f32 2.0, %v683_v43  ;;  %v685_v46 = vpop.f32.mrb[55].mxu0  ;;  %v767_v48 = vsub.f32 %v3022_v58, %v729_v40  ;;  %v749_v40 = vsub.f32 %v3022_v58, %v711_v24  ;;  %v752_v43 = vsub.f32 %v3022_v58, %v714_v33 }
 0x1b9   : > { %825 = vmin.index.xlane.f32.xlu0 %v767_v48  ;;  %v768_v50 = vsub.f32 %v3022_v58, %v730_v45 }
 0x1bb   : > { %827 = vmin.index.xlane.f32.xlu1 %v768_v50 }
 0x1bc   : > { %v688_v51 = vpop.f32.mrb[56].mxu0 }
 0x1bd   : > { %v731_v52 = vmul.f32 2.0, %v688_v51  ;;  %v690_v53 = vpop.f32.mrb[57].mxu0 }
 0x1be   : > { %v691_v54 = vpop.f32.mrb[58].mxu0  ;;  %v2632_v53 = vmov 1.0|1.0  }
 0x1bf   : > { %v732_v0 = vmul.f32 2.0, %v691_v54  ;;  %v693_v55 = vpop.f32.mrb[59].mxu0  ;;  %v769_v56 = vsub.f32 %v3022_v58, %v731_v52 }
 0x1c1   : > { %829 = vmin.index.xlane.f32.xlu0 %v769_v56  ;;  %v770_v57 = vsub.f32 %v3022_v58, %v732_v0 }
 0x1c3   : > { %831 = vmin.index.xlane.f32.xlu1 %v770_v57 }
 0x1c4   : > { %v696_v59 = vpop.f32.mrb[60].mxu0 }
 0x1c5   : > { %v733_v60 = vmul.f32 2.0, %v696_v59  ;;  %v698_v61 = vpop.f32.mrb[61].mxu0 }
 0x1c6   : > { %v699_v62 = vpop.f32.mrb[62].mxu0 }
 0x1c7   : > { %v734_v6 = vmul.f32 2.0, %v699_v62  ;;  %v701_v19 = vpop.f32.mrb[63].mxu0  ;;  %v771_v21 = vsub.f32 %v3022_v58, %v733_v60 }
 0x1c9   : > { %833 = vmin.index.xlane.f32.xlu0 %v771_v21  ;;  %v772_v25 = vsub.f32 %v3022_v58, %v734_v6 }
 0x1cb   : > { %835 = vmin.index.xlane.f32.xlu1 %v772_v25 }
 0x1cd   : > { %773 = vmin.index.xlane.f32.xlu0 %v741_v28 }
 0x1cf   : > { %775 = vmin.index.xlane.f32.xlu1 %v742_v30 }
 0x1d1   : > { %777 = vmin.index.xlane.f32.xlu0 %v743_v32 }
 0x1d3   : > { %779 = vmin.index.xlane.f32.xlu1 %v744_v34 }
 0x1d5   : > { %781 = vmin.index.xlane.f32.xlu0 %v745_v35 }
 0x1d7   : > { %783 = vmin.index.xlane.f32.xlu1 %v746_v36 }
 0x1d9   : > { %785 = vmin.index.xlane.f32.xlu0 %v747_v37 }
 0x1db   : > { %787 = vmin.index.xlane.f32.xlu1 %v748_v38 }
 0x1dd   : > { %789 = vmin.index.xlane.f32.xlu0 %v749_v40 }
 0x1df   : > { %791 = vmin.index.xlane.f32.xlu1 %v750_v42 }
 0x1e1   : > { %793 = vmin.index.xlane.f32.xlu0 %v751_v39 }
 0x1e3   : > { %795 = vmin.index.xlane.f32.xlu1 %v752_v43 }
 0x20e   : > { %v798_v45 = vpop.xlane.xlu0 %797 }
 0x20f   : > { %vm851_vm0 = vcmp.eq.s32.totalorder %v3079_v47, %v798_v45 }
 0x210   : > { %v3088_v58 = vsel %vm851_vm0, 1.0, %v2631_v49 }
 0x211   : > { %v2261_v46 = vpack.c.bf16 %v3088_v58, %v3088_v58 }
 0x212   : > { %v800_v48 = vpop.xlane.xlu0 %799 }
 0x213   : > { %1542 = vst.msk [vmem:[%s3085_s19 + $0x30] sm:$0xf] %vm1529_vm1, %v2261_v46  ;;  %vm852_vm2 = vcmp.eq.s32.totalorder %v3079_v47, %v800_v48 }
 0x214   : > { %v3096_v50 = vsel %vm852_vm2, 1.0, %v2631_v49  ;;  %vm3098_vm3 = vmpackc.low %vm852_vm2, %vm851_vm0 }
 0x215   : > { %v2262_v52 = vpack.c.bf16 %v3096_v50, %v3096_v50  ;;  %2158 = vmatmul.mubr.msk.bf16.vlgmr.msra.gmra.mrb[0].mxu1 %vm3098_vm3, %v2632_v53 }
 0x216   : > { %1225 = vmatpush1.bf16.msra.mxu1 %v2801_v1  ;;  %v802_v54 = vpop.xlane.xlu1 %801  ;;  %1133 = vmatprep.mubr.bf16.mxu1 %v2630_v44 }
 0x217   : > { %1543 = vst.msk [vmem:[%s3085_s19 + $0x34] sm:$0xf] %vm1529_vm1, %v2262_v52  ;;  %vm853_vm4 = vcmp.eq.s32.totalorder %v3079_v47, %v802_v54  ;;  %1226 = vmatprep.subr.bf16.mxu1 %v2807_v2 }
 0x218   : > { %v3114_v0 = vsel %vm853_vm4, 1.0, %v2631_v49 }
 0x219   : > { %v2263_v55 = vpack.c.bf16 %v3114_v0, %v3114_v0 }
 0x21a   : > { %v804_v56 = vpop.xlane.xlu1 %803  ;;  %1227 = vmatpush1.bf16.msra.mxu1 %v2814_v3 }
 0x21b   : > { %1544 = vst.msk [vmem:[%s3085_s19 + $0x38] sm:$0xf] %vm1529_vm1, %v2263_v55  ;;  %vm854_vm5 = vcmp.eq.s32.totalorder %v3079_v47, %v804_v56  ;;  %1228 = vmatprep.subr.bf16.mxu1 %v2819_v4 }
 0x21c   : > { %v3124_v1 = vsel %vm854_vm5, 1.0, %v2631_v49  ;;  %vm3126_vm6 = vmpackc.low %vm854_vm5, %vm853_vm4 }
 0x21d   : > { %v2264_v57 = vpack.c.bf16 %v3124_v1, %v3124_v1  ;;  %2160 = vmatmul.mubr.msk.bf16.gmra.mrb[4].mxu1 %vm3126_vm6, %v2632_v53 }
 0x21e   : > { %v806_v3 = vpop.xlane.xlu0 %805  ;;  %1143 = vmatprep.mubr.bf16.mxu1 %v2630_v44  ;;  %1229 = vmatpush1.bf16.msra.mxu1 %v2828_v8 }
 0x21f   : > { %1545 = vst.msk [vmem:[%s3085_s19 + $0x3c] sm:$0xf] %vm1529_vm1, %v2264_v57  ;;  %vm855_vm7 = vcmp.eq.s32.totalorder %v3079_v47, %v806_v3  ;;  %1230 = vmatprep.subr.bf16.mxu1 %v2833_v9 }
 0x220   : > { %v3142_v4 = vsel %vm855_vm7, 1.0, %v2631_v49  ;;  %v808_v59 = vpop.xlane.xlu1 %807 }
 0x221   : > { %v2265_v60 = vpack.c.bf16 %v3142_v4, %v3142_v4  ;;  %vm856_vm8 = vcmp.eq.s32.totalorder %v3079_v47, %v808_v59 }
 0x222   : > { %v3148_v61 = vsel %vm856_vm8, 1.0, %v2631_v49  ;;  %1231 = vmatpush1.bf16.msra.mxu1 %v2840_v10  ;;  %vm3156_vm9 = vmpackc.low %vm856_vm8, %vm855_vm7 }
 0x223   : > { %1546 = vst.msk [vmem:[%s3085_s19 + $0x40] sm:$0xf] %vm1529_vm1, %v2265_v60  ;;  %v2266_v8 = vpack.c.bf16 %v3148_v61, %v3148_v61  ;;  %1232 = vmatprep.subr.bf16.mxu1 %v2845_v11 }
 0x225   : > { %1547 = vst.msk [vmem:[%s3085_s19 + $0x44] sm:$0xf] %vm1529_vm1, %v2266_v8  ;;  %2162 = vmatmul.mubr.msk.bf16.gmra.mrb[8].mxu1 %vm3156_vm9, %v2632_v53  ;;  %v3765_v8 = vmov 0 }
 0x226   : > { %v810_v10 = vpop.xlane.xlu0 %809  ;;  %1153 = vmatprep.mubr.bf16.mxu1 %v2630_v44  ;;  %1233 = vmatpush1.bf16.msra.mxu1 %v2852_v12 }
 0x227   : > { %vm857_vm10 = vcmp.eq.s32.totalorder %v3079_v47, %v810_v10  ;;  %1234 = vmatprep.subr.bf16.mxu1 %v2857_v13 }
 0x228   : > { %v3170_v11 = vsel %vm857_vm10, 1.0, %v2631_v49  ;;  %v812_v62 = vpop.xlane.xlu1 %811 }
 0x229   : > { %v2267_v63 = vpack.c.bf16 %v3170_v11, %v3170_v11  ;;  %vm858_vm11 = vcmp.eq.s32.totalorder %v3079_v47, %v812_v62 }
 0x22a   : > { %v3176_v6 = vsel %vm858_vm11, 1.0, %v2631_v49  ;;  %1235 = vmatpush1.bf16.msra.mxu1 %v2864_v14  ;;  %vm3184_vm12 = vmpackc.low %vm858_vm11, %vm857_vm10 }
 0x22b   : > { %1548 = vst.msk [vmem:[%s3085_s19 + $0x48] sm:$0xf] %vm1529_vm1, %v2267_v63  ;;  %v2268_v12 = vpack.c.bf16 %v3176_v6, %v3176_v6  ;;  %1236 = vmatprep.subr.bf16.mxu1 %v2869_v15 }
 0x22d   : > { %1549 = vst.msk [vmem:[%s3085_s19 + $0x4c] sm:$0xf] %vm1529_vm1, %v2268_v12  ;;  %2164 = vmatmul.mubr.msk.bf16.gmra.mrb[12].mxu1 %vm3184_vm12, %v2632_v53 }
 0x22e   : > { %v814_v14 = vpop.xlane.xlu0 %813  ;;  %1163 = vmatprep.mubr.bf16.mxu1 %v2630_v44  ;;  %1237 = vmatpush1.bf16.msra.mxu1 %v2876_v16 }
 0x22f   : > { %vm859_vm13 = vcmp.eq.s32.totalorder %v3079_v47, %v814_v14  ;;  %1238 = vmatprep.subr.bf16.mxu1 %v2881_v17 }
 0x230   : > { %v3198_v15 = vsel %vm859_vm13, 1.0, %v2631_v49  ;;  %v816_v19 = vpop.xlane.xlu1 %815 }
 0x231   : > { %v2269_v21 = vpack.c.bf16 %v3198_v15, %v3198_v15  ;;  %vm860_vm14 = vcmp.eq.s32.totalorder %v3079_v47, %v816_v19 }
 0x232   : > { %v3204_v23 = vsel %vm860_vm14, 1.0, %v2631_v49  ;;  %1239 = vmatpush1.bf16.msra.mxu1 %v2888_v18  ;;  %vm3211_vm15 = vmpackc.low %vm860_vm14, %vm859_vm13 }
 0x233   : > { %1550 = vst.msk [vmem:[%s3085_s19 + $0x50] sm:$0xf] %vm1529_vm1, %v2269_v21  ;;  %v2270_v16 = vpack.c.bf16 %v3204_v23, %v3204_v23 }
 0x235   : > { %1551 = vst.msk [vmem:[%s3085_s19 + $0x54] sm:$0xf] %vm1529_vm1, %v2270_v16  ;;  %2166 = vmatmul.mubr.msk.bf16.gmra.mrb[16].mxu1 %vm3211_vm15, %v2632_v53 }
 0x236   : > { %v818_v25 = vpop.xlane.xlu0 %817  ;;  %1173 = vmatprep.mubr.bf16.mxu1 %v2630_v44 }
 0x237   : > { %vm861_vm0 = vcmp.eq.s32.totalorder %v3079_v47, %v818_v25 }
 0x238   : > { %v3223_v18 = vsel %vm861_vm0, 1.0, %v2631_v49  ;;  %v820_v27 = vpop.xlane.xlu1 %819 }
 0x239   : > { %v2271_v28 = vpack.c.bf16 %v3223_v18, %v3223_v18  ;;  %vm862_vm2 = vcmp.eq.s32.totalorder %v3079_v47, %v820_v27 }
 0x23a   : > { %v3229_v29 = vsel %vm862_vm2, 1.0, %v2631_v49  ;;  %vm3235_vm4 = vmpackc.low %vm862_vm2, %vm861_vm0 }
 0x23b   : > { %1552 = vst.msk [vmem:[%s3085_s19 + $0x58] sm:$0xf] %vm1529_vm1, %v2271_v28  ;;  %v2272_v30 = vpack.c.bf16 %v3229_v29, %v3229_v29 }
 0x23d   : > { %1553 = vst.msk [vmem:[%s3085_s19 + $0x5c] sm:$0xf] %vm1529_vm1, %v2272_v30  ;;  %2168 = vmatmul.mubr.msk.bf16.gmra.mrb[20].mxu1 %vm3235_vm4, %v2632_v53 }
 0x23e   : > { %v822_v32 = vpop.xlane.xlu0 %821  ;;  %1183 = vmatprep.mubr.bf16.mxu1 %v2630_v44 }
 0x23f   : > { %vm863_vm5 = vcmp.eq.s32.totalorder %v3079_v47, %v822_v32 }
 0x240   : > { %v3247_v7 = vsel %vm863_vm5, 1.0, %v2631_v49  ;;  %v824_v34 = vpop.xlane.xlu1 %823 }
 0x241   : > { %v2273_v20 = vpack.c.bf16 %v3247_v7, %v3247_v7  ;;  %vm864_vm7 = vcmp.eq.s32.totalorder %v3079_v47, %v824_v34 }
 0x242   : > { %v3253_v35 = vsel %vm864_vm7, 1.0, %v2631_v49  ;;  %vm3259_vm8 = vmpackc.low %vm864_vm7, %vm863_vm5 }
 0x243   : > { %1554 = vst.msk [vmem:[%s3085_s19 + $0x60] sm:$0xf] %vm1529_vm1, %v2273_v20  ;;  %v2274_v22 = vpack.c.bf16 %v3253_v35, %v3253_v35 }
 0x245   : > { %1555 = vst.msk [vmem:[%s3085_s19 + $0x64] sm:$0xf] %vm1529_vm1, %v2274_v22  ;;  %2170 = vmatmul.mubr.msk.bf16.gmra.mrb[24].mxu1 %vm3259_vm8, %v2632_v53 }
 0x246   : > { %v826_v24 = vpop.xlane.xlu0 %825  ;;  %1193 = vmatprep.mubr.bf16.mxu1 %v2630_v44 }
 0x247   : > { %vm865_vm10 = vcmp.eq.s32.totalorder %v3079_v47, %v826_v24 }
 0x248   : > { %v3271_v37 = vsel %vm865_vm10, 1.0, %v2631_v49  ;;  %v828_v26 = vpop.xlane.xlu1 %827 }
 0x249   : > { %v2275_v38 = vpack.c.bf16 %v3271_v37, %v3271_v37  ;;  %vm866_vm11 = vcmp.eq.s32.totalorder %v3079_v47, %v828_v26 }
 0x24a   : > { %v3277_v31 = vsel %vm866_vm11, 1.0, %v2631_v49  ;;  %vm3283_vm13 = vmpackc.low %vm866_vm11, %vm865_vm10 }
 0x24b   : > { %1556 = vst.msk [vmem:[%s3085_s19 + $0x68] sm:$0xf] %vm1529_vm1, %v2275_v38  ;;  %v2276_v40 = vpack.c.bf16 %v3277_v31, %v3277_v31 }
 0x24d   : > { %1557 = vst.msk [vmem:[%s3085_s19 + $0x6c] sm:$0xf] %vm1529_vm1, %v2276_v40  ;;  %2172 = vmatmul.mubr.msk.bf16.gmra.mrb[28].mxu1 %vm3283_vm13, %v2632_v53 }
 0x24e   : > { %v830_v42 = vpop.xlane.xlu0 %829  ;;  %1203 = vmatprep.mubr.bf16.mxu1 %v2630_v44 }
 0x24f   : > { %vm867_vm14 = vcmp.eq.s32.totalorder %v3079_v47, %v830_v42 }
 0x250   : > { %v3295_v39 = vsel %vm867_vm14, 1.0, %v2631_v49  ;;  %v832_v43 = vpop.xlane.xlu1 %831 }
 0x251   : > { %v2277_v45 = vpack.c.bf16 %v3295_v39, %v3295_v39  ;;  %vm868_vm0 = vcmp.eq.s32.totalorder %v3079_v47, %v832_v43 }
 0x252   : > { %v3301_v46 = vsel %vm868_vm0, 1.0, %v2631_v49  ;;  %vm3307_vm2 = vmpackc.low %vm868_vm0, %vm867_vm14 }
 0x253   : > { %1558 = vst.msk [vmem:[%s3085_s19 + $0x70] sm:$0xf] %vm1529_vm1, %v2277_v45  ;;  %v2278_v48 = vpack.c.bf16 %v3301_v46, %v3301_v46 }
 0x255   : > { %1559 = vst.msk [vmem:[%s3085_s19 + $0x74] sm:$0xf] %vm1529_vm1, %v2278_v48  ;;  %2174 = vmatmul.mubr.msk.bf16.gmra.mrb[32].mxu1 %vm3307_vm2, %v2632_v53 }
 0x256   : > { %v834_v54 = vpop.xlane.xlu0 %833  ;;  %1213 = vmatprep.mubr.bf16.mxu1 %v2630_v44 }
 0x257   : > { %vm869_vm5 = vcmp.eq.s32.totalorder %v3079_v47, %v834_v54 }
 0x258   : > { %v3319_v55 = vsel %vm869_vm5, 1.0, %v2631_v49  ;;  %v836_v56 = vpop.xlane.xlu1 %835 }
 0x259   : > { %v2279_v57 = vpack.c.bf16 %v3319_v55, %v3319_v55  ;;  %vm870_vm7 = vcmp.eq.s32.totalorder %v3079_v47, %v836_v56 }
 0x25a   : > { %v3325_v3 = vsel %vm870_vm7, 1.0, %v2631_v49  ;;  %v774_v59 = vpop.xlane.xlu0 %773  ;;  %vm3332_vm11 = vmpackc.low %vm870_vm7, %vm869_vm5 }
 0x25b   : > { %1560 = vst.msk [vmem:[%s3085_s19 + $0x78] sm:$0xf] %vm1529_vm1, %v2279_v57  ;;  %v2280_v60 = vpack.c.bf16 %v3325_v3, %v3325_v3  ;;  %vm839_vm10 = vcmp.eq.s32.totalorder %v3079_v47, %v774_v59  ;;  %v3766_v8 = vsel %vm3332_vm11, 4294967295, %v3765_v8 }
 0x25c   : > { %v2097_v10 = vsel %vm839_vm10, 1.0, %v2631_v49  ;;  %v776_v62 = vpop.xlane.xlu1 %775 }
 0x25d   : > { %1561 = vst.msk [vmem:[%s3085_s19 + $0x7c] sm:$0xf] %vm1529_vm1, %v2280_v60  ;;  %v2249_v63 = vpack.c.bf16 %v2097_v10, %v2097_v10  ;;  %vm840_vm14 = vcmp.eq.s32.totalorder %v3079_v47, %v776_v62  ;;  %2176 = vmatmul.mubr.msk.bf16.gmra.mrb[36].mxu1 %vm3332_vm11, %v2632_v53 }
 0x25e   : > { %v2098_v12 = vsel %vm840_vm14, 1.0, %v2631_v49  ;;  %vm3344_vm0 = vmpackc.low %vm840_vm14, %vm839_vm10  ;;  %v778_v19 = vpop.xlane.xlu0 %777  ;;  %1256 = vmatprep.mubr.bf16.mxu1 %v2630_v44 }
 0x25f   : > { %1530 = vst.msk [vmem:[%s3085_s19] sm:$0xf] %vm1529_vm1, %v2249_v63  ;;  %v2250_v21 = vpack.c.bf16 %v2098_v12, %v2098_v12  ;;  %v1851_v16 = vadd.f32 %v2098_v12, %v2097_v10  ;;  %vm841_vm5 = vcmp.eq.s32.totalorder %v3079_v47, %v778_v19  ;;  %2146 = vmatmul.mubr.msk.bf16.vlgmr.msra.gmra.mrb[64].mxu0 %vm3344_vm0, %v2632_v53 }
 0x260   : > { %v2099_v25 = vsel %vm841_vm5, 1.0, %v2631_v49  ;;  %v780_v27 = vpop.xlane.xlu1 %779  ;;  %1073 = vmatprep.mubr.bf16.mxu0 %v2630_v44 }
 0x261   : > { %1531 = vst.msk [vmem:[%s3085_s19 + $0x4] sm:$0xf] %vm1529_vm1, %v2250_v21  ;;  %v2251_v28 = vpack.c.bf16 %v2099_v25, %v2099_v25  ;;  %v1852_v30 = vadd.f32 %v2099_v25, %v1851_v16  ;;  %vm842_vm7 = vcmp.eq.s32.totalorder %v3079_v47, %v780_v27 }
 0x262   : > { %v2100_v32 = vsel %vm842_vm7, 1.0, %v2631_v49  ;;  %v782_v34 = vpop.xlane.xlu0 %781  ;;  %vm3377_vm11 = vmpackc.low %vm842_vm7, %vm841_vm5 }
 0x263   : > { %1532 = vst.msk [vmem:[%s3085_s19 + $0x8] sm:$0xf] %vm1529_vm1, %v2251_v28  ;;  %v2252_v20 = vpack.c.bf16 %v2100_v32, %v2100_v32  ;;  %v1853_v22 = vadd.f32 %v2100_v32, %v1852_v30  ;;  %vm843_vm10 = vcmp.eq.s32.totalorder %v3079_v47, %v782_v34 }
 0x264   : > { %v2101_v24 = vsel %vm843_vm10, 1.0, %v2631_v49  ;;  %v784_v26 = vpop.xlane.xlu1 %783 }
 0x265   : > { %1533 = vst.msk [vmem:[%s3085_s19 + $0xc] sm:$0xf] %vm1529_vm1, %v2252_v20  ;;  %v2253_v38 = vpack.c.bf16 %v2101_v24, %v2101_v24  ;;  %v1854_v40 = vadd.f32 %v2101_v24, %v1853_v22  ;;  %vm844_vm14 = vcmp.eq.s32.totalorder %v3079_v47, %v784_v26  ;;  %2178 = vmatmul.mubr.msk.bf16.vlgmr.msra.gmra.mrb[40].mxu1 %vm3344_vm0, %v2632_v53 }
 0x266   : > { %v2102_v43 = vsel %vm844_vm14, 1.0, %v2631_v49  ;;  %v786_v45 = vpop.xlane.xlu0 %785  ;;  %1266 = vmatprep.mubr.bf16.mxu1 %v2630_v44 }
 0x267   : > { %1534 = vst.msk [vmem:[%s3085_s19 + $0x10] sm:$0xf] %vm1529_vm1, %v2253_v38  ;;  %v2254_v48 = vpack.c.bf16 %v2102_v43, %v2102_v43  ;;  %v1855_v54 = vadd.f32 %v2102_v43, %v1854_v40  ;;  %vm3739_vm0 = vcmp.eq.s32.totalorder %v3079_v47, %v786_v45  ;;  %2148 = vmatmul.mubr.msk.bf16.gmra.mrb[68].mxu0 %vm3377_vm11, %v2632_v53 }
 0x268   : > { %v2103_v56 = vsel %vm3739_vm0, 1.0, %v2631_v49  ;;  %v788_v57 = vpop.xlane.xlu1 %787  ;;  %1083 = vmatprep.mubr.bf16.mxu0 %v2630_v44  ;;  %vm3417_vm0 = vmpackc.low %vm844_vm14, %vm843_vm10  ;;  %vm3773_vm14 = vcmp.eq.s32.totalorder %v3079_v47, %v786_v45 }
 0x269   : > { %1535 = vst.msk [vmem:[%s3085_s19 + $0x14] sm:$0xf] %vm1529_vm1, %v2254_v48  ;;  %v2255_v59 = vpack.c.bf16 %v2103_v56, %v2103_v56  ;;  %v1856_v60 = vadd.f32 %v2103_v56, %v1855_v54  ;;  %vm3738_vm5 = vcmp.eq.s32.totalorder %v3079_v47, %v788_v57 }
 0x26a   : > { %v2104_v10 = vsel %vm3738_vm5, 1.0, %v2631_v49  ;;  %v790_v62 = vpop.xlane.xlu0 %789 }
 0x26b   : > { %1536 = vst.msk [vmem:[%s3085_s19 + $0x18] sm:$0xf] %vm1529_vm1, %v2255_v59  ;;  %v2256_v63 = vpack.c.bf16 %v2104_v10, %v2104_v10  ;;  %v1857_v12 = vadd.f32 %v2104_v10, %v1856_v60  ;;  %vm847_vm7 = vcmp.eq.s32.totalorder %v3079_v47, %v790_v62  ;;  %v2466_v59 = vld [vmem:[%s2787_s15 + $0x8] sm:$0xff] }
 0x26c   : > { %v2105_v14 = vsel %vm847_vm7, 1.0, %v2631_v49  ;;  %v792_v19 = vpop.xlane.xlu1 %791 }
 0x26d   : > { %1537 = vst.msk [vmem:[%s3085_s19 + $0x1c] sm:$0xf] %vm1529_vm1, %v2256_v63  ;;  %v2257_v21 = vpack.c.bf16 %v2105_v14, %v2105_v14  ;;  %v1858_v16 = vadd.f32 %v2105_v14, %v1857_v12  ;;  %vm3741_vm5 = vcmp.eq.s32.totalorder %v3079_v47, %v792_v19  ;;  %2180 = vmatmul.mubr.msk.bf16.gmra.mrb[44].mxu1 %vm3377_vm11, %v2632_v53  ;;  %v2467_v63 = vld [vmem:[%s2787_s15 + $0x10] sm:$0xff] }
 0x26e   : > { %v2106_v27 = vsel %vm3741_vm5, 1.0, %v2631_v49  ;;  %v794_v28 = vpop.xlane.xlu0 %793  ;;  %1276 = vmatprep.mubr.bf16.mxu1 %v2630_v44 }
 0x26f   : > { %1538 = vst.msk [vmem:[%s3085_s19 + $0x20] sm:$0xf] %vm1529_vm1, %v2257_v21  ;;  %v2258_v30 = vpack.c.bf16 %v2106_v27, %v2106_v27  ;;  %v1859_v32 = vadd.f32 %v2106_v27, %v1858_v16  ;;  %vm3740_vm11 = vcmp.eq.s32.totalorder %v3079_v47, %v794_v28  ;;  %2150 = vmatmul.mubr.msk.bf16.gmra.mrb[72].mxu0 %vm3417_vm0, %v2632_v53 }
 0x270   : > { %v2107_v34 = vsel %vm3740_vm11, 1.0, %v2631_v49  ;;  %v796_v20 = vpop.xlane.xlu1 %795  ;;  %1093 = vmatprep.mubr.bf16.mxu0 %v2630_v44  ;;  %vm3774_vm11 = vcmp.eq.s32.totalorder %v3079_v47, %v788_v57 }
 0x271   : > { %1539 = vst.msk [vmem:[%s3085_s19 + $0x24] sm:$0xf] %vm1529_vm1, %v2258_v30  ;;  %v2259_v22 = vpack.c.bf16 %v2107_v34, %v2107_v34  ;;  %v1860_v24 = vadd.f32 %v2107_v34, %v1859_v32  ;;  %vm850_vm10 = vcmp.eq.s32.totalorder %v3079_v47, %v796_v20  ;;  %vm2151_vm5 = vmpackc.low %vm3774_vm11, %vm3773_vm14 }
 0x272   : > { %v2108_v26 = vsel %vm850_vm10, 1.0, %v2631_v49 }
 0x273   : > { %1540 = vst.msk [vmem:[%s3085_s19 + $0x28] sm:$0xf] %vm1529_vm1, %v2259_v22  ;;  %v2260_v38 = vpack.c.bf16 %v2108_v26, %v2108_v26  ;;  %v1861_v40 = vadd.f32 %v2108_v26, %v1860_v24 }
 0x275   : > { %1541 = vst.msk [vmem:[%s3085_s19 + $0x2c] sm:$0xf] %vm1529_vm1, %v2260_v38  ;;  %v1862_v42 = vadd.f32 %v3088_v58, %v1861_v40  ;;  %2182 = vmatmul.mubr.msk.bf16.gmra.mrb[48].mxu1 %vm3417_vm0, %v2632_v53  ;;  %vm3775_vm1 = vcmp.eq.s32.totalorder %v3079_v47, %v792_v19  ;;  %v2468_v19 = vld [vmem:[%s2787_s15 + $0x18] sm:$0xff]  ;;  %v2469_v40 = vld [vmem:[%s2787_s15 + $0x20] sm:$0xff]  ;;  %s2633_s19 = smov [#allocation5]  }
 0x276   : > { %1286 = vmatprep.mubr.bf16.mxu1 %v2630_v44  ;;  %vm2153_vm0 = vmpackc.low %vm3775_vm1, %vm847_vm7  ;;  %s2563_s12 = sshll.u32 %s2633_s19, 4  ;;  %s2564_s12 = int_to_ptr.vmem [resolvable:$false] %s2563_s12 }
 0x277   : > { %v1863_v49 = vadd.f32 %v3096_v50, %v1862_v42  ;;  %2152 = vmatmul.mubr.msk.bf16.gmra.mrb[76].mxu0 %vm2151_vm5, %v2632_v53  ;;  %s2565_s9 = scalar_lea.vmem %s2564_s12, 16384  ;;  %p2566_p0 = scmp.lt.s32.totalorder %s3672_s18, %s2564_s12 }
 0x278   : > { %1103 = vmatprep.mubr.bf16.mxu0 %v2630_v44  ;;  %p2567_p2 = scmp.lt.s32.totalorder %s2565_s9, %s2559_s29 }
 0x279   : > { %v1864_v43 = vadd.f32 %v3114_v0, %v1863_v49 }
 0x27a   : > { %p2568_p4 = por %p2567_p2, %p2566_p0 }
 0x27b   : > { %v1865_v58 = vadd.f32 %v3124_v1, %v1864_v43 }
 0x27c   : > { %p2569_p5 = pnand %p2568_p4, %p2562_p10 }
 0x27d   : > { %v1866_v48 = vadd.f32 %v3142_v4, %v1865_v58  ;;  %2184 = vmatmul.mubr.msk.bf16.gmra.mrb[52].mxu1 %vm2151_vm5, %v2632_v53  ;;  %vm3776_vm5 = vcmp.eq.s32.totalorder %v3079_v47, %v794_v28 }
 0x27e   : > { %1296 = vmatprep.mubr.bf16.mxu1 %v2630_v44  ;;  %vm2155_vm7 = vmpackc.low %vm850_vm10, %vm3776_vm5 }
 0x27f   : > { %v1867_v50 = vadd.f32 %v3148_v61, %v1866_v48  ;;  %2154 = vmatmul.mubr.msk.bf16.gmra.mrb[80].mxu0 %vm2153_vm0, %v2632_v53  ;;  %v2470_v48 = vld [vmem:[%s2787_s15 + $0x28] sm:$0xff] }
 0x280   : > { %1113 = vmatprep.mubr.bf16.mxu0 %v2630_v44 }
 0x281   : > { %v1868_v0 = vadd.f32 %v3170_v11, %v1867_v50 }
 0x283   : > { %v1869_v1 = vadd.f32 %v3176_v6, %v1868_v0 }
 0x285   : > { %v1870_v4 = vadd.f32 %v3198_v15, %v1869_v1  ;;  %2186 = vmatmul.mubr.msk.bf16.gmra.mrb[56].mxu1 %vm2153_vm0, %v2632_v53 }
 0x286   : > { %1306 = vmatprep.mubr.bf16.mxu1 %v2630_v44 }
 0x287   : > { %v1871_v61 = vadd.f32 %v3204_v23, %v1870_v4  ;;  %2156 = vmatmul.mubr.msk.bf16.gmra.mrb[84].mxu0 %vm2155_vm7, %v2632_v53 }
 0x289   : > { %v1872_v45 = vadd.f32 %v3223_v18, %v1871_v61  ;;  %v2471_v61 = vld [vmem:[%s2787_s15 + $0x30] sm:$0xff] }
 0x28b   : > { %v1873_v11 = vadd.f32 %v3229_v29, %v1872_v45 }
 0x28d   : > { %v1874_v6 = vadd.f32 %v3247_v7, %v1873_v11  ;;  %2188 = vmatmul.mubr.msk.bf16.gmra.mrb[60].mxu1 %vm2155_vm7, %v2632_v53 }
 0x28e   : > { %1316 = vmatprep.mubr.bf16.mxu1 %v2630_v44 }
 0x28f   : > { %v1875_v47 = vadd.f32 %v3253_v35, %v1874_v6 }
 0x291   : > { %v1876_v15 = vadd.f32 %v3271_v37, %v1875_v47  ;;  %v2472_v47 = vld [vmem:[%s2787_s15 + $0x38] sm:$0xff] }
 0x293   : > { %v1877_v23 = vadd.f32 %v3277_v31, %v1876_v15 }
 0x295   : > { %v1878_v54 = vadd.f32 %v3295_v39, %v1877_v23  ;;  %2190 = vmatmul.mubr.msk.bf16.gmra.mrb[0].mxu1 %vm3098_vm3, %v2632_v53  ;;  %vm3777_vm3 = vnez %v3766_v8 }
 0x296   : > { %1326 = vmatprep.mubr.bf16.mxu1 %v2630_v44 }
 0x297   : > { %v1879_v18 = vadd.f32 %v3301_v46, %v1878_v54 }
 0x299   : > { %v1880_v29 = vadd.f32 %v3319_v55, %v1879_v18 }
 0x29b   : > { %v1881_v7 = vadd.f32 %v3325_v3, %v1880_v29 }
 0x29d   : > { %2192 = vmatmul.mubr.msk.bf16.gmra.mrb[4].mxu1 %vm3126_vm6, %v2632_v53  ;;  %v1882_v35 = vrot.slane %v1881_v7, 4 }
 0x29e   : > { %1336 = vmatprep.mubr.bf16.mxu1 %v2630_v44 }
 0x29f   : > { %v1883_v37 = vadd.f32 %v1882_v35, %v1881_v7 }
 0x2a1   : > { %v1884_v31 = vrot.slane %v1883_v37, 2 }
 0x2a3   : > { %v1885_v51 = vadd.f32 %v1884_v31, %v1883_v37 }
 0x2a5   : > { %2194 = vmatmul.mubr.msk.bf16.gmra.mrb[8].mxu1 %vm3156_vm9, %v2632_v53  ;;  %v1886_v39 = vrot.slane %v1885_v51, 1 }
 0x2a6   : > { %1346 = vmatprep.mubr.bf16.mxu1 %v2630_v44 }
 0x2a7   : > { %v1887_v2 = vadd.f32 %v1886_v39, %v1885_v51 }
 0x2a9   : > { %1888 = vst [vmem:[%s331_s8] sm:$0x1] %v1887_v2 }
 0x2ad   : > { %2196 = vmatmul.mubr.msk.bf16.gmra.mrb[12].mxu1 %vm3184_vm12, %v2632_v53 }
 0x2ae   : > { %1356 = vmatprep.mubr.bf16.mxu1 %v2630_v44 }
 0x2b5   : > { %2198 = vmatmul.mubr.msk.bf16.gmra.mrb[16].mxu1 %vm3211_vm15, %v2632_v53 }
 0x2b6   : > { %1366 = vmatprep.mubr.bf16.mxu1 %v2630_v44 }
 0x2bd   : > { %2200 = vmatmul.mubr.msk.bf16.gmra.mrb[20].mxu1 %vm3235_vm4, %v2632_v53 }
 0x2be   : > { %1376 = vmatprep.mubr.bf16.mxu1 %v2630_v44 }
 0x2c5   : > { %2202 = vmatmul.mubr.msk.bf16.gmra.mrb[24].mxu1 %vm3259_vm8, %v2632_v53 }
 0x2c6   : > { %1386 = vmatprep.mubr.bf16.mxu1 %v2630_v44 }
 0x2cd   : > { %2204 = vmatmul.mubr.msk.bf16.gmra.mrb[28].mxu1 %vm3283_vm13, %v2632_v53 }
 0x2ce   : > { %1396 = vmatprep.mubr.bf16.mxu1 %v2630_v44 }
 0x2d5   : > { %2206 = vmatmul.mubr.msk.bf16.gmra.mrb[32].mxu1 %vm3307_vm2, %v2632_v53 }
 0x2d6   : > { %1406 = vmatprep.mubr.bf16.mxu1 %v2630_v44  ;;  %v2465_v44 = vld [vmem:[%s2787_s15] sm:$0xff] }
 0x2dd   : > { %2208 = vmatmul.mubr.msk.bf16.gmra.mrb[36].mxu1 %vm3777_vm3, %v2632_v53 }
 0x332   : > { %v1065_v9 = vpop.f32.mrb[64].mxu0 }
 0x333   : > { %v1067_v13 = vpop.f32.mrb[65].mxu0 }
 0x334   : > { %v1069_v17 = vpop.f32.mrb[66].mxu0 }
 0x335   : > { %v1071_v5 = vpop.f32.mrb[67].mxu0 }
 0x338   : > { %v1258_v36 = vpop.f32.mrb[40].mxu1 }
 0x339   : > { %v1259_v33 = vadd.f32 %v1258_v36, %v1065_v9  ;;  %v1260_v46 = vpop.f32.mrb[41].mxu1 }
 0x33a   : > { %v1261_v55 = vadd.f32 %v1260_v46, %v1067_v13  ;;  %v1075_v3 = vpop.f32.mrb[68].mxu0  ;;  %v1262_v52 = vpop.f32.mrb[42].mxu1  ;;  %v2473_v13 = vld [vmem:[%s2787_s15 + $0x40] sm:$0xff]  ;;  %v2474_v46 = vld [vmem:[%s2787_s15 + $0x48] sm:$0xff] }
 0x33b   : > { %1562 = vst [vmem:[%s3541_s11] sm:$0xff] %v1259_v33  ;;  %v1626_v53 = vsub.f32 %v1259_v33, %v2465_v44  ;;  %v1263_v8 = vadd.f32 %v1262_v52, %v1069_v17  ;;  %v1077_v56 = vpop.f32.mrb[69].mxu0  ;;  %v1264_v57 = vpop.f32.mrb[43].mxu1 }
 0x33c   : > { %1563 = vst [vmem:[%s3541_s11 + $0x8] sm:$0xff] %v1261_v55  ;;  %v1627_v60 = vsub.f32 %v1261_v55, %v2466_v59  ;;  %v1265_v10 = vadd.f32 %v1264_v57, %v1071_v5  ;;  %v1079_v62 = vpop.f32.mrb[70].mxu0  ;;  %v2476_v59 = vld [vmem:[%s2787_s15 + $0x58] sm:$0xff] }
 0x33d   : > { %1564 = vst [vmem:[%s3541_s11 + $0x10] sm:$0xff] %v1263_v8  ;;  %v1628_v12 = vsub.f32 %v1263_v8, %v2467_v63  ;;  %v1081_v14 = vpop.f32.mrb[71].mxu0  ;;  %v1690_v16 = vmul.f32 %v1626_v53, %v1626_v53  ;;  %v2475_v53 = vld [vmem:[%s2787_s15 + $0x50] sm:$0xff] }
 0x33e   : > { %1565 = vst [vmem:[%s3541_s11 + $0x18] sm:$0xff] %v1265_v10  ;;  %v1629_v21 = vsub.f32 %v1265_v10, %v2468_v19  ;;  %v1691_v27 = vmul.f32 %v1627_v60, %v1627_v60 }
 0x33f   : > { %v1692_v25 = vmul.f32 %v1628_v12, %v1628_v12 }
 0x340   : > { %v1693_v28 = vmul.f32 %v1629_v21, %v1629_v21  ;;  %v1268_v30 = vpop.f32.mrb[44].mxu1 }
 0x341   : > { %v1754_v32 = vadd.f32 %v1692_v25, %v1690_v16  ;;  %v1269_v34 = vadd.f32 %v1268_v30, %v1075_v3  ;;  %v1270_v20 = vpop.f32.mrb[45].mxu1 }
 0x342   : > { %v1791_v22 = vadd.f32 %v1693_v28, %v1691_v27  ;;  %v1271_v24 = vadd.f32 %v1270_v20, %v1077_v56  ;;  %v1085_v26 = vpop.f32.mrb[72].mxu0  ;;  %v1272_v38 = vpop.f32.mrb[46].mxu1 }
 0x343   : > { %1566 = vst [vmem:[%s3541_s11 + $0x20] sm:$0xff] %v1269_v34  ;;  %v1630_v42 = vsub.f32 %v1269_v34, %v2469_v40  ;;  %v1273_v49 = vadd.f32 %v1272_v38, %v1079_v62  ;;  %v1087_v43 = vpop.f32.mrb[73].mxu0  ;;  %v1274_v58 = vpop.f32.mrb[47].mxu1 }
 0x344   : > { %1567 = vst [vmem:[%s3541_s11 + $0x28] sm:$0xff] %v1271_v24  ;;  %v1631_v50 = vsub.f32 %v1271_v24, %v2470_v48  ;;  %v1275_v0 = vadd.f32 %v1274_v58, %v1081_v14  ;;  %v1089_v1 = vpop.f32.mrb[74].mxu0 }
 0x345   : > { %v1694_v4 = vmul.f32 %v1630_v42, %v1630_v42  ;;  %1568 = vst [vmem:[%s3541_s11 + $0x30] sm:$0xff] %v1273_v49  ;;  %v1632_v45 = vsub.f32 %v1273_v49, %v2471_v61  ;;  %v1091_v11 = vpop.f32.mrb[75].mxu0 }
 0x346   : > { %v1695_v6 = vmul.f32 %v1631_v50, %v1631_v50  ;;  %1569 = vst [vmem:[%s3541_s11 + $0x38] sm:$0xff] %v1275_v0  ;;  %v1633_v15 = vsub.f32 %v1275_v0, %v2472_v47  ;;  %v2480_v0 = vld [vmem:[%s2787_s15 + $0x78] sm:$0xff] }
 0x347   : > { %v1755_v23 = vadd.f32 %v1754_v32, %v1694_v4  ;;  %v1696_v54 = vmul.f32 %v1632_v45, %v1632_v45  ;;  %v2477_v32 = vld [vmem:[%s2787_s15 + $0x60] sm:$0xff] }
 0x348   : > { %v1792_v18 = vadd.f32 %v1791_v22, %v1695_v6  ;;  %v1697_v29 = vmul.f32 %v1633_v15, %v1633_v15  ;;  %v1278_v7 = vpop.f32.mrb[48].mxu1 }
 0x349   : > { %v1756_v35 = vadd.f32 %v1755_v23, %v1696_v54  ;;  %v1279_v37 = vadd.f32 %v1278_v7, %v1085_v26  ;;  %v1280_v31 = vpop.f32.mrb[49].mxu1  ;;  %v2478_v26 = vld [vmem:[%s2787_s15 + $0x68] sm:$0xff] }
 0x34a   : > { %v1793_v51 = vadd.f32 %v1792_v18, %v1697_v29  ;;  %v1281_v39 = vadd.f32 %v1280_v31, %v1087_v43  ;;  %v1095_v2 = vpop.f32.mrb[76].mxu0  ;;  %v1282_v9 = vpop.f32.mrb[50].mxu1  ;;  %v2479_v43 = vld [vmem:[%s2787_s15 + $0x70] sm:$0xff] }
 0x34b   : > { %1570 = vst [vmem:[%s3541_s11 + $0x40] sm:$0xff] %v1279_v37  ;;  %v1634_v17 = vsub.f32 %v1279_v37, %v2473_v13  ;;  %v1283_v5 = vadd.f32 %v1282_v9, %v1089_v1  ;;  %v1097_v36 = vpop.f32.mrb[77].mxu0  ;;  %v1284_v33 = vpop.f32.mrb[51].mxu1 }
 0x34c   : > { %1571 = vst [vmem:[%s3541_s11 + $0x48] sm:$0xff] %v1281_v39  ;;  %v1635_v55 = vsub.f32 %v1281_v39, %v2474_v46  ;;  %v1285_v3 = vadd.f32 %v1284_v33, %v1091_v11  ;;  %v1099_v52 = vpop.f32.mrb[78].mxu0 }
 0x34d   : > { %v1698_v44 = vmul.f32 %v1634_v17, %v1634_v17  ;;  %1572 = vst [vmem:[%s3541_s11 + $0x50] sm:$0xff] %v1283_v5  ;;  %v1636_v8 = vsub.f32 %v1283_v5, %v2475_v53  ;;  %v1101_v56 = vpop.f32.mrb[79].mxu0 }
 0x34e   : > { %v1699_v57 = vmul.f32 %v1635_v55, %v1635_v55  ;;  %1573 = vst [vmem:[%s3541_s11 + $0x58] sm:$0xff] %v1285_v3  ;;  %v1637_v60 = vsub.f32 %v1285_v3, %v2476_v59  ;;  %v2484_v3 = vld [vmem:[%s2787_s15 + $0x98] sm:$0xff] }
 0x34f   : > { %v1757_v10 = vadd.f32 %v1756_v35, %v1698_v44  ;;  %v1700_v62 = vmul.f32 %v1636_v8, %v1636_v8  ;;  %v2481_v35 = vld [vmem:[%s2787_s15 + $0x80] sm:$0xff] }
 0x350   : > { %v1794_v63 = vadd.f32 %v1793_v51, %v1699_v57  ;;  %v1701_v12 = vmul.f32 %v1637_v60, %v1637_v60  ;;  %v1288_v14 = vpop.f32.mrb[52].mxu1 }
 0x351   : > { %v1758_v19 = vadd.f32 %v1757_v10, %v1700_v62  ;;  %v1289_v21 = vadd.f32 %v1288_v14, %v1095_v2  ;;  %v1290_v16 = vpop.f32.mrb[53].mxu1  ;;  %v2482_v2 = vld [vmem:[%s2787_s15 + $0x88] sm:$0xff]  ;;  %v2485_v14 = vld [vmem:[%s2787_s15 + $0xa0] sm:$0xff] }
 0x352   : > { %v1795_v25 = vadd.f32 %v1794_v63, %v1701_v12  ;;  %v1291_v27 = vadd.f32 %v1290_v16, %v1097_v36  ;;  %v1105_v28 = vpop.f32.mrb[80].mxu0  ;;  %v1292_v30 = vpop.f32.mrb[54].mxu1  ;;  %v2483_v36 = vld [vmem:[%s2787_s15 + $0x90] sm:$0xff] }
 0x353   : > { %1574 = vst [vmem:[%s3541_s11 + $0x60] sm:$0xff] %v1289_v21  ;;  %v1638_v34 = vsub.f32 %v1289_v21, %v2477_v32  ;;  %v1293_v20 = vadd.f32 %v1292_v30, %v1099_v52  ;;  %v1107_v22 = vpop.f32.mrb[81].mxu0  ;;  %v1294_v24 = vpop.f32.mrb[55].mxu1  ;;  %v2487_v32 = vld [vmem:[%s2787_s15 + $0xb0] sm:$0xff] }
 0x354   : > { %1575 = vst [vmem:[%s3541_s11 + $0x68] sm:$0xff] %v1291_v27  ;;  %v1639_v38 = vsub.f32 %v1291_v27, %v2478_v26  ;;  %v1295_v40 = vadd.f32 %v1294_v24, %v1101_v56  ;;  %v1109_v42 = vpop.f32.mrb[82].mxu0 }
 0x355   : > { %v1702_v49 = vmul.f32 %v1638_v34, %v1638_v34  ;;  %1576 = vst [vmem:[%s3541_s11 + $0x70] sm:$0xff] %v1293_v20  ;;  %v1640_v58 = vsub.f32 %v1293_v20, %v2479_v43  ;;  %v1111_v48 = vpop.f32.mrb[83].mxu0 }
 0x356   : > { %v1703_v50 = vmul.f32 %v1639_v38, %v1639_v38  ;;  %1577 = vst [vmem:[%s3541_s11 + $0x78] sm:$0xff] %v1295_v40  ;;  %v1641_v1 = vsub.f32 %v1295_v40, %v2480_v0 }
 0x357   : > { %v1759_v4 = vadd.f32 %v1758_v19, %v1702_v49  ;;  %v1704_v61 = vmul.f32 %v1640_v58, %v1640_v58  ;;  %v2489_v58 = vld [vmem:[%s2787_s15 + $0xc0] sm:$0xff] }
 0x358   : > { %v1796_v45 = vadd.f32 %v1795_v25, %v1703_v50  ;;  %v1705_v11 = vmul.f32 %v1641_v1, %v1641_v1  ;;  %v1298_v6 = vpop.f32.mrb[56].mxu1  ;;  %v2486_v25 = vld [vmem:[%s2787_s15 + $0xa8] sm:$0xff] }
 0x359   : > { %v1760_v47 = vadd.f32 %v1759_v4, %v1704_v61  ;;  %v1299_v15 = vadd.f32 %v1298_v6, %v1105_v28  ;;  %v1300_v23 = vpop.f32.mrb[57].mxu1  ;;  %v2490_v1 = vld [vmem:[%s2787_s15 + $0xc8] sm:$0xff] }
 0x35a   : > { %v1797_v54 = vadd.f32 %v1796_v45, %v1705_v11  ;;  %v1301_v18 = vadd.f32 %v1300_v23, %v1107_v22  ;;  %v1115_v29 = vpop.f32.mrb[84].mxu0  ;;  %v1302_v7 = vpop.f32.mrb[58].mxu1  ;;  %v2488_v22 = vld [vmem:[%s2787_s15 + $0xb8] sm:$0xff]  ;;  %v2491_v11 = vld [vmem:[%s2787_s15 + $0xd0] sm:$0xff] }
 0x35b   : > { %1578 = vst [vmem:[%s3541_s11 + $0x80] sm:$0xff] %v1299_v15  ;;  %v1642_v37 = vsub.f32 %v1299_v15, %v2481_v35  ;;  %v1303_v31 = vadd.f32 %v1302_v7, %v1109_v42  ;;  %v1117_v51 = vpop.f32.mrb[85].mxu0  ;;  %v1304_v39 = vpop.f32.mrb[59].mxu1  ;;  %v2492_v23 = vld [vmem:[%s2787_s15 + $0xd8] sm:$0xff] }
 0x35c   : > { %1579 = vst [vmem:[%s3541_s11 + $0x88] sm:$0xff] %v1301_v18  ;;  %v1643_v9 = vsub.f32 %v1301_v18, %v2482_v2  ;;  %v1305_v13 = vadd.f32 %v1304_v39, %v1111_v48  ;;  %v1119_v17 = vpop.f32.mrb[86].mxu0  ;;  %v2493_v39 = vld [vmem:[%s2787_s15 + $0xe0] sm:$0xff] }
 0x35d   : > { %v1706_v5 = vmul.f32 %v1642_v37, %v1642_v37  ;;  %1580 = vst [vmem:[%s3541_s11 + $0x90] sm:$0xff] %v1303_v31  ;;  %v1644_v33 = vsub.f32 %v1303_v31, %v2483_v36  ;;  %v1121_v46 = vpop.f32.mrb[87].mxu0 }
 0x35e   : > { %v1707_v55 = vmul.f32 %v1643_v9, %v1643_v9  ;;  %1581 = vst [vmem:[%s3541_s11 + $0x98] sm:$0xff] %v1305_v13  ;;  %v1645_v52 = vsub.f32 %v1305_v13, %v2484_v3  ;;  %v2494_v13 = vld [vmem:[%s2787_s15 + $0xe8] sm:$0xff] }
 0x35f   : > { %v1761_v44 = vadd.f32 %v1760_v47, %v1706_v5  ;;  %v1708_v53 = vmul.f32 %v1644_v33, %v1644_v33  ;;  %v2495_v33 = vld [vmem:[%s2787_s15 + $0xf0] sm:$0xff] }
 0x360   : > { %v1798_v8 = vadd.f32 %v1797_v54, %v1707_v55  ;;  %v1709_v56 = vmul.f32 %v1645_v52, %v1645_v52  ;;  %v1308_v57 = vpop.f32.mrb[60].mxu1  ;;  %v2496_v52 = vld [vmem:[%s2787_s15 + $0xf8] sm:$0xff] }
 0x361   : > { %v1762_v59 = vadd.f32 %v1761_v44, %v1708_v53  ;;  %v1309_v60 = vadd.f32 %v1308_v57, %v1115_v29  ;;  %v1310_v10 = vpop.f32.mrb[61].mxu1 }
 0x362   : > { %v1799_v62 = vadd.f32 %v1798_v8, %v1709_v56  ;;  %v1311_v63 = vadd.f32 %v1310_v10, %v1117_v51  ;;  %v1312_v12 = vpop.f32.mrb[62].mxu1 }
 0x363   : > { %1582 = vst [vmem:[%s3541_s11 + $0xa0] sm:$0xff] %v1309_v60  ;;  %v1646_v19 = vsub.f32 %v1309_v60, %v2485_v14  ;;  %v1313_v21 = vadd.f32 %v1312_v12, %v1119_v17  ;;  %v1314_v16 = vpop.f32.mrb[63].mxu1  ;;  %v2498_v14 = vld [vmem:[%s2787_s15 + $0x108] sm:$0xff] }
 0x364   : > { %1583 = vst [vmem:[%s3541_s11 + $0xa8] sm:$0xff] %v1311_v63  ;;  %v1647_v27 = vsub.f32 %v1311_v63, %v2486_v25  ;;  %v1315_v28 = vadd.f32 %v1314_v16, %v1121_v46  ;;  %v2499_v25 = vld [vmem:[%s2787_s15 + $0x110] sm:$0xff] }
 0x365   : > { %v1710_v30 = vmul.f32 %v1646_v19, %v1646_v19  ;;  %1584 = vst [vmem:[%s3541_s11 + $0xb0] sm:$0xff] %v1313_v21  ;;  %v1648_v34 = vsub.f32 %v1313_v21, %v2487_v32  ;;  %v2500_v32 = vld [vmem:[%s2787_s15 + $0x118] sm:$0xff] }
 0x366   : > { %v1711_v20 = vmul.f32 %v1647_v27, %v1647_v27  ;;  %1585 = vst [vmem:[%s3541_s11 + $0xb8] sm:$0xff] %v1315_v28  ;;  %v1649_v24 = vsub.f32 %v1315_v28, %v2488_v22 }
 0x367   : > { %v1763_v26 = vadd.f32 %v1762_v59, %v1710_v30  ;;  %v1712_v38 = vmul.f32 %v1648_v34, %v1648_v34 }
 0x368   : > { %v1800_v40 = vadd.f32 %v1799_v62, %v1711_v20  ;;  %v1713_v42 = vmul.f32 %v1649_v24, %v1649_v24  ;;  %v1318_v49 = vpop.f32.mrb[0].mxu1  ;;  %v2497_v62 = vld [vmem:[%s2787_s15 + $0x100] sm:$0xff] }
 0x369   : > { %v1764_v43 = vadd.f32 %v1763_v26, %v1712_v38  ;;  %1586 = vst [vmem:[%s3541_s11 + $0xc0] sm:$0xff] %v1318_v49  ;;  %v1650_v48 = vsub.f32 %v1318_v49, %v2489_v58  ;;  %v1320_v50 = vpop.f32.mrb[1].mxu1  ;;  %v2501_v49 = vld [vmem:[%s2787_s15 + $0x120] sm:$0xff] }
 0x36a   : > { %v1801_v0 = vadd.f32 %v1800_v40, %v1713_v42  ;;  %1587 = vst [vmem:[%s3541_s11 + $0xc8] sm:$0xff] %v1320_v50  ;;  %v1651_v4 = vsub.f32 %v1320_v50, %v2490_v1  ;;  %v1322_v61 = vpop.f32.mrb[2].mxu1 }
 0x36b   : > { %v1714_v45 = vmul.f32 %v1650_v48, %v1650_v48  ;;  %1588 = vst [vmem:[%s3541_s11 + $0xd0] sm:$0xff] %v1322_v61  ;;  %v1652_v6 = vsub.f32 %v1322_v61, %v2491_v11  ;;  %v1324_v47 = vpop.f32.mrb[3].mxu1  ;;  %v2502_v48 = vld [vmem:[%s2787_s15 + $0x128] sm:$0xff] }
 0x36c   : > { %v1715_v15 = vmul.f32 %v1651_v4, %v1651_v4  ;;  %1589 = vst [vmem:[%s3541_s11 + $0xd8] sm:$0xff] %v1324_v47  ;;  %v1653_v54 = vsub.f32 %v1324_v47, %v2492_v23  ;;  %v2503_v4 = vld [vmem:[%s2787_s15 + $0x130] sm:$0xff] }
 0x36d   : > { %v1765_v18 = vadd.f32 %v1764_v43, %v1714_v45  ;;  %v1716_v29 = vmul.f32 %v1652_v6, %v1652_v6  ;;  %v2504_v6 = vld [vmem:[%s2787_s15 + $0x138] sm:$0xff] }
 0x36e   : > { %v1802_v7 = vadd.f32 %v1801_v0, %v1715_v15  ;;  %v1717_v35 = vmul.f32 %v1653_v54, %v1653_v54 }
 0x36f   : > { %v1766_v37 = vadd.f32 %v1765_v18, %v1716_v29 }
 0x370   : > { %v1803_v31 = vadd.f32 %v1802_v7, %v1717_v35  ;;  %v1328_v51 = vpop.f32.mrb[4].mxu1 }
 0x371   : > { %1590 = vst [vmem:[%s3541_s11 + $0xe0] sm:$0xff] %v1328_v51  ;;  %v1654_v2 = vsub.f32 %v1328_v51, %v2493_v39  ;;  %v1330_v9 = vpop.f32.mrb[5].mxu1  ;;  %v2506_v39 = vld [vmem:[%s2787_s15 + $0x148] sm:$0xff] }
 0x372   : > { %1591 = vst [vmem:[%s3541_s11 + $0xe8] sm:$0xff] %v1330_v9  ;;  %v1655_v17 = vsub.f32 %v1330_v9, %v2494_v13  ;;  %v1332_v5 = vpop.f32.mrb[6].mxu1 }
 0x373   : > { %v1718_v36 = vmul.f32 %v1654_v2, %v1654_v2  ;;  %1592 = vst [vmem:[%s3541_s11 + $0xf0] sm:$0xff] %v1332_v5  ;;  %v1656_v46 = vsub.f32 %v1332_v5, %v2495_v33  ;;  %v1334_v55 = vpop.f32.mrb[7].mxu1 }
 0x374   : > { %v1719_v3 = vmul.f32 %v1655_v17, %v1655_v17  ;;  %1593 = vst [vmem:[%s3541_s11 + $0xf8] sm:$0xff] %v1334_v55  ;;  %v1657_v44 = vsub.f32 %v1334_v55, %v2496_v52  ;;  %v2507_v17 = vld [vmem:[%s2787_s15 + $0x150] sm:$0xff] }
 0x375   : > { %v1767_v53 = vadd.f32 %v1766_v37, %v1718_v36  ;;  %v1720_v8 = vmul.f32 %v1656_v46, %v1656_v46  ;;  %v2505_v37 = vld [vmem:[%s2787_s15 + $0x140] sm:$0xff]  ;;  %v2508_v46 = vld [vmem:[%s2787_s15 + $0x158] sm:$0xff] }
 0x376   : > { %v1804_v56 = vadd.f32 %v1803_v31, %v1719_v3  ;;  %v1721_v57 = vmul.f32 %v1657_v44, %v1657_v44 }
 0x377   : > { %v1768_v59 = vadd.f32 %v1767_v53, %v1720_v8 }
 0x378   : > { %v1805_v60 = vadd.f32 %v1804_v56, %v1721_v57  ;;  %v1338_v10 = vpop.f32.mrb[8].mxu1 }
 0x379   : > { %1594 = vst [vmem:[%s3541_s11 + $0x100] sm:$0xff] %v1338_v10  ;;  %v1658_v63 = vsub.f32 %v1338_v10, %v2497_v62  ;;  %v1340_v12 = vpop.f32.mrb[9].mxu1  ;;  %v2510_v62 = vld [vmem:[%s2787_s15 + $0x168] sm:$0xff] }
 0x37a   : > { %1595 = vst [vmem:[%s3541_s11 + $0x108] sm:$0xff] %v1340_v12  ;;  %v1659_v19 = vsub.f32 %v1340_v12, %v2498_v14  ;;  %v1342_v21 = vpop.f32.mrb[10].mxu1 }
 0x37b   : > { %v1722_v16 = vmul.f32 %v1658_v63, %v1658_v63  ;;  %1596 = vst [vmem:[%s3541_s11 + $0x110] sm:$0xff] %v1342_v21  ;;  %v1660_v27 = vsub.f32 %v1342_v21, %v2499_v25  ;;  %v1344_v28 = vpop.f32.mrb[11].mxu1 }
 0x37c   : > { %v1723_v30 = vmul.f32 %v1659_v19, %v1659_v19  ;;  %1597 = vst [vmem:[%s3541_s11 + $0x118] sm:$0xff] %v1344_v28  ;;  %v1661_v34 = vsub.f32 %v1344_v28, %v2500_v32  ;;  %v2511_v19 = vld [vmem:[%s2787_s15 + $0x170] sm:$0xff] }
 0x37d   : > { %v1769_v20 = vadd.f32 %v1768_v59, %v1722_v16  ;;  %v1724_v22 = vmul.f32 %v1660_v27, %v1660_v27  ;;  %v2509_v59 = vld [vmem:[%s2787_s15 + $0x160] sm:$0xff]  ;;  %v2512_v27 = vld [vmem:[%s2787_s15 + $0x178] sm:$0xff] }
 0x37e   : > { %v1806_v24 = vadd.f32 %v1805_v60, %v1723_v30  ;;  %v1725_v26 = vmul.f32 %v1661_v34, %v1661_v34 }
 0x37f   : > { %v1770_v38 = vadd.f32 %v1769_v20, %v1724_v22 }
 0x380   : > { %v1807_v40 = vadd.f32 %v1806_v24, %v1725_v26  ;;  %v1348_v42 = vpop.f32.mrb[12].mxu1 }
 0x381   : > { %1598 = vst [vmem:[%s3541_s11 + $0x120] sm:$0xff] %v1348_v42  ;;  %v1662_v43 = vsub.f32 %v1348_v42, %v2501_v49  ;;  %v1350_v58 = vpop.f32.mrb[13].mxu1  ;;  %v2514_v49 = vld [vmem:[%s2787_s15 + $0x188] sm:$0xff] }
 0x382   : > { %1599 = vst [vmem:[%s3541_s11 + $0x128] sm:$0xff] %v1350_v58  ;;  %v1663_v50 = vsub.f32 %v1350_v58, %v2502_v48  ;;  %v1352_v0 = vpop.f32.mrb[14].mxu1 }
 0x383   : > { %v1726_v1 = vmul.f32 %v1662_v43, %v1662_v43  ;;  %1600 = vst [vmem:[%s3541_s11 + $0x130] sm:$0xff] %v1352_v0  ;;  %v1664_v61 = vsub.f32 %v1352_v0, %v2503_v4  ;;  %v1354_v45 = vpop.f32.mrb[15].mxu1 }
 0x384   : > { %v1727_v11 = vmul.f32 %v1663_v50, %v1663_v50  ;;  %1601 = vst [vmem:[%s3541_s11 + $0x138] sm:$0xff] %v1354_v45  ;;  %v1665_v47 = vsub.f32 %v1354_v45, %v2504_v6  ;;  %v2515_v50 = vld [vmem:[%s2787_s15 + $0x190] sm:$0xff] }
 0x385   : > { %v1771_v15 = vadd.f32 %v1770_v38, %v1726_v1  ;;  %v1728_v23 = vmul.f32 %v1664_v61, %v1664_v61  ;;  %v2513_v38 = vld [vmem:[%s2787_s15 + $0x180] sm:$0xff]  ;;  %v2516_v61 = vld [vmem:[%s2787_s15 + $0x198] sm:$0xff] }
 0x386   : > { %v1808_v54 = vadd.f32 %v1807_v40, %v1727_v11  ;;  %v1729_v18 = vmul.f32 %v1665_v47, %v1665_v47 }
 0x387   : > { %v1772_v29 = vadd.f32 %v1771_v15, %v1728_v23 }
 0x388   : > { %v1809_v7 = vadd.f32 %v1808_v54, %v1729_v18  ;;  %v1358_v35 = vpop.f32.mrb[16].mxu1 }
 0x389   : > { %1602 = vst [vmem:[%s3541_s11 + $0x140] sm:$0xff] %v1358_v35  ;;  %v1666_v31 = vsub.f32 %v1358_v35, %v2505_v37  ;;  %v1360_v51 = vpop.f32.mrb[17].mxu1  ;;  %v2518_v37 = vld [vmem:[%s2787_s15 + $0x1a8] sm:$0xff] }
 0x38a   : > { %1603 = vst [vmem:[%s3541_s11 + $0x148] sm:$0xff] %v1360_v51  ;;  %v1667_v2 = vsub.f32 %v1360_v51, %v2506_v39  ;;  %v1362_v9 = vpop.f32.mrb[18].mxu1 }
 0x38b   : > { %v1730_v13 = vmul.f32 %v1666_v31, %v1666_v31  ;;  %1604 = vst [vmem:[%s3541_s11 + $0x150] sm:$0xff] %v1362_v9  ;;  %v1668_v5 = vsub.f32 %v1362_v9, %v2507_v17  ;;  %v1364_v36 = vpop.f32.mrb[19].mxu1 }
 0x38c   : > { %v1731_v33 = vmul.f32 %v1667_v2, %v1667_v2  ;;  %1605 = vst [vmem:[%s3541_s11 + $0x158] sm:$0xff] %v1364_v36  ;;  %v1669_v55 = vsub.f32 %v1364_v36, %v2508_v46  ;;  %v2519_v2 = vld [vmem:[%s2787_s15 + $0x1b0] sm:$0xff] }
 0x38d   : > { %v1773_v3 = vadd.f32 %v1772_v29, %v1730_v13  ;;  %v1732_v52 = vmul.f32 %v1668_v5, %v1668_v5  ;;  %v2517_v29 = vld [vmem:[%s2787_s15 + $0x1a0] sm:$0xff]  ;;  %v2520_v5 = vld [vmem:[%s2787_s15 + $0x1b8] sm:$0xff] }
 0x38e   : > { %v1810_v44 = vadd.f32 %v1809_v7, %v1731_v33  ;;  %v1733_v53 = vmul.f32 %v1669_v55, %v1669_v55 }
 0x38f   : > { %v1774_v8 = vadd.f32 %v1773_v3, %v1732_v52 }
 0x390   : > { %v1811_v56 = vadd.f32 %v1810_v44, %v1733_v53  ;;  %v1368_v57 = vpop.f32.mrb[20].mxu1 }
 0x391   : > { %1606 = vst [vmem:[%s3541_s11 + $0x160] sm:$0xff] %v1368_v57  ;;  %v1670_v60 = vsub.f32 %v1368_v57, %v2509_v59  ;;  %v1370_v10 = vpop.f32.mrb[21].mxu1  ;;  %v2522_v59 = vld [vmem:[%s2787_s15 + $0x1c8] sm:$0xff] }
 0x392   : > { %1607 = vst [vmem:[%s3541_s11 + $0x168] sm:$0xff] %v1370_v10  ;;  %v1671_v63 = vsub.f32 %v1370_v10, %v2510_v62  ;;  %v1372_v12 = vpop.f32.mrb[22].mxu1 }
 0x393   : > { %v1734_v14 = vmul.f32 %v1670_v60, %v1670_v60  ;;  %1608 = vst [vmem:[%s3541_s11 + $0x170] sm:$0xff] %v1372_v12  ;;  %v1672_v21 = vsub.f32 %v1372_v12, %v2511_v19  ;;  %v1374_v16 = vpop.f32.mrb[23].mxu1 }
 0x394   : > { %v1735_v25 = vmul.f32 %v1671_v63, %v1671_v63  ;;  %1609 = vst [vmem:[%s3541_s11 + $0x178] sm:$0xff] %v1374_v16  ;;  %v1673_v28 = vsub.f32 %v1374_v16, %v2512_v27  ;;  %v2523_v63 = vld [vmem:[%s2787_s15 + $0x1d0] sm:$0xff] }
 0x395   : > { %v1775_v30 = vadd.f32 %v1774_v8, %v1734_v14  ;;  %v1736_v32 = vmul.f32 %v1672_v21, %v1672_v21  ;;  %v2521_v8 = vld [vmem:[%s2787_s15 + $0x1c0] sm:$0xff]  ;;  %v2524_v21 = vld [vmem:[%s2787_s15 + $0x1d8] sm:$0xff] }
 0x396   : > { %v1812_v34 = vadd.f32 %v1811_v56, %v1735_v25  ;;  %v1737_v20 = vmul.f32 %v1673_v28, %v1673_v28 }
 0x397   : > { %v1776_v22 = vadd.f32 %v1775_v30, %v1736_v32 }
 0x398   : > { %v1813_v24 = vadd.f32 %v1812_v34, %v1737_v20  ;;  %v1378_v26 = vpop.f32.mrb[24].mxu1 }
 0x399   : > { %1610 = vst [vmem:[%s3541_s11 + $0x180] sm:$0xff] %v1378_v26  ;;  %v1674_v40 = vsub.f32 %v1378_v26, %v2513_v38  ;;  %v1380_v42 = vpop.f32.mrb[25].mxu1  ;;  %v2526_v38 = vld [vmem:[%s2787_s15 + $0x1e8] sm:$0xff] }
 0x39a   : > { %1611 = vst [vmem:[%s3541_s11 + $0x188] sm:$0xff] %v1380_v42  ;;  %v1675_v43 = vsub.f32 %v1380_v42, %v2514_v49  ;;  %v1382_v58 = vpop.f32.mrb[26].mxu1 }
 0x39b   : > { %v1738_v48 = vmul.f32 %v1674_v40, %v1674_v40  ;;  %1612 = vst [vmem:[%s3541_s11 + $0x190] sm:$0xff] %v1382_v58  ;;  %v1676_v0 = vsub.f32 %v1382_v58, %v2515_v50  ;;  %v1384_v1 = vpop.f32.mrb[27].mxu1 }
 0x39c   : > { %v1739_v4 = vmul.f32 %v1675_v43, %v1675_v43  ;;  %1613 = vst [vmem:[%s3541_s11 + $0x198] sm:$0xff] %v1384_v1  ;;  %v1677_v45 = vsub.f32 %v1384_v1, %v2516_v61  ;;  %v2527_v43 = vld [vmem:[%s2787_s15 + $0x1f0] sm:$0xff] }
 0x39d   : > { %v1777_v11 = vadd.f32 %v1776_v22, %v1738_v48  ;;  %v1740_v6 = vmul.f32 %v1676_v0, %v1676_v0  ;;  %v2525_v22 = vld [vmem:[%s2787_s15 + $0x1e0] sm:$0xff]  ;;  %v2528_v0 = vld [vmem:[%s2787_s15 + $0x1f8] sm:$0xff] }
 0x39e   : > { %v1814_v47 = vadd.f32 %v1813_v24, %v1739_v4  ;;  %v1741_v15 = vmul.f32 %v1677_v45, %v1677_v45 }
 0x39f   : > { %v1778_v23 = vadd.f32 %v1777_v11, %v1740_v6 }
 0x3a0   : > { %v1815_v54 = vadd.f32 %v1814_v47, %v1741_v15  ;;  %v1388_v18 = vpop.f32.mrb[28].mxu1 }
 0x3a1   : > { %1614 = vst [vmem:[%s3541_s11 + $0x1a0] sm:$0xff] %v1388_v18  ;;  %v1678_v7 = vsub.f32 %v1388_v18, %v2517_v29  ;;  %v1390_v35 = vpop.f32.mrb[29].mxu1 }
 0x3a2   : > { %1615 = vst [vmem:[%s3541_s11 + $0x1a8] sm:$0xff] %v1390_v35  ;;  %v1679_v31 = vsub.f32 %v1390_v35, %v2518_v37  ;;  %v1392_v51 = vpop.f32.mrb[30].mxu1 }
 0x3a3   : > { %v1742_v39 = vmul.f32 %v1678_v7, %v1678_v7  ;;  %1616 = vst [vmem:[%s3541_s11 + $0x1b0] sm:$0xff] %v1392_v51  ;;  %v1680_v9 = vsub.f32 %v1392_v51, %v2519_v2  ;;  %v1394_v13 = vpop.f32.mrb[31].mxu1 }
 0x3a4   : > { %v1743_v17 = vmul.f32 %v1679_v31, %v1679_v31  ;;  %1617 = vst [vmem:[%s3541_s11 + $0x1b8] sm:$0xff] %v1394_v13  ;;  %v1681_v36 = vsub.f32 %v1394_v13, %v2520_v5 }
 0x3a5   : > { %v1779_v33 = vadd.f32 %v1778_v23, %v1742_v39  ;;  %v1744_v46 = vmul.f32 %v1680_v9, %v1680_v9 }
 0x3a6   : > { %v1816_v55 = vadd.f32 %v1815_v54, %v1743_v17  ;;  %v1745_v3 = vmul.f32 %v1681_v36, %v1681_v36 }
 0x3a7   : > { %v1780_v52 = vadd.f32 %v1779_v33, %v1744_v46 }
 0x3a8   : > { %v1817_v44 = vadd.f32 %v1816_v55, %v1745_v3  ;;  %v1398_v53 = vpop.f32.mrb[32].mxu1 }
 0x3a9   : > { %1618 = vst [vmem:[%s3541_s11 + $0x1c0] sm:$0xff] %v1398_v53  ;;  %v1682_v56 = vsub.f32 %v1398_v53, %v2521_v8  ;;  %v1400_v57 = vpop.f32.mrb[33].mxu1 }
 0x3aa   : > { %1619 = vst [vmem:[%s3541_s11 + $0x1c8] sm:$0xff] %v1400_v57  ;;  %v1683_v60 = vsub.f32 %v1400_v57, %v2522_v59  ;;  %v1402_v10 = vpop.f32.mrb[34].mxu1 }
 0x3ab   : > { %v1746_v62 = vmul.f32 %v1682_v56, %v1682_v56  ;;  %1620 = vst [vmem:[%s3541_s11 + $0x1d0] sm:$0xff] %v1402_v10  ;;  %v1684_v12 = vsub.f32 %v1402_v10, %v2523_v63  ;;  %v1404_v14 = vpop.f32.mrb[35].mxu1 }
 0x3ac   : > { %v1747_v19 = vmul.f32 %v1683_v60, %v1683_v60  ;;  %1621 = vst [vmem:[%s3541_s11 + $0x1d8] sm:$0xff] %v1404_v14  ;;  %v1685_v16 = vsub.f32 %v1404_v14, %v2524_v21 }
 0x3ad   : > { %v1781_v25 = vadd.f32 %v1780_v52, %v1746_v62  ;;  %v1748_v27 = vmul.f32 %v1684_v12, %v1684_v12 }
 0x3ae   : > { %v1818_v28 = vadd.f32 %v1817_v44, %v1747_v19  ;;  %v1749_v30 = vmul.f32 %v1685_v16, %v1685_v16 }
 0x3af   : > { %v1782_v32 = vadd.f32 %v1781_v25, %v1748_v27 }
 0x3b0   : > { %v1819_v34 = vadd.f32 %v1818_v28, %v1749_v30  ;;  %v1408_v20 = vpop.f32.mrb[36].mxu1 }
 0x3b1   : > { %1622 = vst [vmem:[%s3541_s11 + $0x1e0] sm:$0xff] %v1408_v20  ;;  %v1686_v24 = vsub.f32 %v1408_v20, %v2525_v22  ;;  %v1410_v26 = vpop.f32.mrb[37].mxu1 }
 0x3b2   : > { %1623 = vst [vmem:[%s3541_s11 + $0x1e8] sm:$0xff] %v1410_v26  ;;  %v1687_v40 = vsub.f32 %v1410_v26, %v2526_v38  ;;  %v1412_v42 = vpop.f32.mrb[38].mxu1 }
 0x3b3   : > { %v1750_v49 = vmul.f32 %v1686_v24, %v1686_v24  ;;  %1624 = vst [vmem:[%s3541_s11 + $0x1f0] sm:$0xff] %v1412_v42  ;;  %v1688_v58 = vsub.f32 %v1412_v42, %v2527_v43  ;;  %v1414_v48 = vpop.f32.mrb[39].mxu1 }
 0x3b4   : > { %v1751_v50 = vmul.f32 %v1687_v40, %v1687_v40  ;;  %1625 = vst [vmem:[%s3541_s11 + $0x1f8] sm:$0xff] %v1414_v48  ;;  %v1689_v1 = vsub.f32 %v1414_v48, %v2528_v0 }
 0x3b5   : > { %v1783_v4 = vadd.f32 %v1782_v32, %v1750_v49  ;;  %v1752_v61 = vmul.f32 %v1688_v58, %v1688_v58 }
 0x3b6   : > { %2572 = shalt.err (!%p2569_p5)
}
 0x3b7   : > { %s2573_s15 = scalar_lea.hbm %s3670_s23, 8192  ;;  %s2577_s17 = scalar_lea.hbm %s3733_s5, 16384 }
 0x3b8   : > { %p2574_p7 = scmp.ne.s32.totalorder %s3670_s23, %s2573_s15  ;;  %p2578_p3 = scmp.lt.u32.totalorder %s3670_s23, %s3733_s5 }
 0x3b9   : > { %p2579_p6 = scmp.lt.u32.totalorder %s2577_s17, %s2573_s15  ;;  %p2581_p12 = scmp.lt.u32.totalorder %s2573_s15, %s3670_s23 }
 0x3ba   : > { %p2575_p9 = pnand %p2574_p7, %p3778_p13 }
 0x3bb   : > { %p2580_p11 = por %p2579_p6, %p2578_p3 }
 0x3bc   : > { %p2576_p1 = pneg %p2575_p9 }
 0x3bd   : > { %p2582_p8 = por %p2581_p12, %p2580_p11 }
 0x3bf   : > { %p2583_p10 = pnand %p2582_p8, %p2576_p1 }
 0x3c1   : > { %2586 = shalt.err (!%p2583_p10)
}
 0x3c2   : > { %s2634_s29 = smov 256   ;;  %s2635_s19 = smov 16   ;;  %v1820_v45 = vadd.f32 %v1819_v34, %v1751_v50  ;;  %v1753_v11 = vmul.f32 %v1689_v1, %v1689_v1  ;;  %v1784_v6 = vadd.f32 %v1783_v4, %v1752_v61  ;;  %v2636_v29 = vmov 1966171168  }
 0x3c3   : > { %2365 = dma.vmem_to_hbm [thread:$0]  (%p3778_p13), %s3672_s18, 8192, %s3670_s23, %s1895_s28, %s2634_s29, %s2634_s29, %s2635_s19   ;;  %v1832_v7 = vunpack.c.l.s4 %v2636_v29  ;;  %v1835_v2 = vshrl.u32 %v837_v41, 7  ;;  %vm1848_vm6 = vcmp.lt.s32.totalorder %v837_v41, 256 }
 0x3c4   : > { %v1821_v47 = vadd.f32 %v1820_v45, %v1753_v11  ;;  %v1785_v15 = vrot.slane %v1784_v6, 4  ;;  %s2079_s13 = sshll.u32 %s3502_s21, 1 }
 0x3c5   : > { %v1833_v39 = vunpack.c.0.s8 %v1832_v7  ;;  %s328_s23 = scalar_lea.vmem %s3734_s6, %s2079_s13 }
 0x3c6   : > { %v1822_v23 = vrot.slane %v1821_v47, 4  ;;  %v1786_v54 = vadd.f32 %v1785_v15, %v1784_v6 }
 0x3c7   : > { %v1836_v36 = vsub.s32 %v1833_v39, %v1835_v2 }
 0x3c8   : > { %v1823_v18 = vadd.f32 %v1822_v23, %v1821_v47  ;;  %v1787_v35 = vrot.slane %v1786_v54, 2 }
 0x3ca   : > { %v1824_v37 = vrot.slane %v1823_v18, 2  ;;  %v1788_v31 = vadd.f32 %v1787_v35, %v1786_v54 }
 0x3cc   : > { %v1825_v51 = vadd.f32 %v1824_v37, %v1823_v18  ;;  %v1789_v9 = vrot.slane %v1788_v31, 1 }
 0x3ce   : > { %v1826_v13 = vrot.slane %v1825_v51, 1  ;;  %v1790_v17 = vadd.f32 %v1789_v9, %v1788_v31 }
 0x3d0   : > { %v1827_v5 = vadd.f32 %v1826_v13, %v1825_v51 }
 0x3d2   : > { %v1830_v33 = vcombine.low %v1790_v17, %v1827_v5 }
 0x3d4   : > { %v1837_v46 = vrot.slane %v1830_v33, %v1836_v36 }
 0x3d6   : > { %v1844_v55 = vrot.slane %v1837_v46, %v1836_v36 }
 0x3d8   : > { %1850 = vst.msk [vmem:[%s328_s23] sm:$0x3] %vm1848_vm6, %v1844_v55 }
 0x3d9 PF: > { %s1949_s28 = sand.u32 1, %s2613_s24   ;;  %p3779_p13 = scmp.ne.s32.totalorder %s3745_s14, 0 }
 0x3da   : > { %p3780_p0 = scmp.ge.s32.totalorder %s2625_s27, 2  ;;  %s1950_s12 = scalar_lea.sflag [#allocation4], %s1949_s28 }
 0x3dc   : > { %p2372_p2 = pnand %p3780_p0, %p3779_p13 }
 0x3de   : > { %2608 = dma.done.wait (!%p2372_p2), %s1950_s12, 8192  }
 0x3df   : > { %2610 = vsyncadd (!%p2372_p2), %s1950_s12, 4294959104  ;;  %p21_p4 = scmp.ge.s32.totalorder %s2702_s30, 4   ;;  %s3781_s24 = smov %s2617_s25 }
 0x3e0   : > { %s3782_s25 = smov %s2621_s26  ;;  %s3783_s26 = smov %s2714_s10 }
 0x3e1   : > { %s3784_s27 = smov %s2702_s30  ;;  %23 = sbr.rel (!%p21_p4) target bundleno = 5 (0x5), region = 117 }
 0x3e8   :  { %1968 = vsyncpa [#allocation3], 1 }
 0x3e9   :  { %1970 = vsyncpa [#allocation3 + $0x1], 1 }
 0x3ea   :  { %1971 = vsyncpa [#allocation4], 1 }
 0x3eb   :  { %1973 = vsyncpa [#allocation4 + $0x1], 1 }

</bundles_post_ra>
